<compile_context>
chip_gen: v6e
topology: v6e:2x2x1
jax: 0.10.0
libtpu: 0.0.40
codegen_flags: <defaults>
</compile_context>

<pallas_src>
import functools

import jax
import jax.numpy as jnp
import numpy as np
from jax.experimental import pallas as pl
from jax.experimental.pallas import tpu as pltpu


_LANE = 128       # lane width
_OC_CHUNK = 8     # Cout sublane chunk (one vreg height)
_MAX_TM = 1024    # lane-tile cap: both (8, tM) accumulators stay within ~16 vregs
_MAX_TCI = 8      # Cin rows per grid step (rest becomes the reduction grid axis)
_MAX_TCO = 64     # Cout tile cap (bounds the in-kernel chunk unroll to 8)


# ----------------------------------------------------------------------------
# Helpers
# ----------------------------------------------------------------------------
def _round_up(x, m):
    return ((x + m - 1) // m) * m


def _vmem_capacity_bytes():
    """Per-core VMEM capacity; conservative 64 MiB fallback (v7x) if unavailable."""
    try:
        info = pltpu.get_tpu_info()
        cap = getattr(info, "vmem_capacity_bytes", None)
        if cap:
            return int(cap)
    except Exception:
        pass
    return 64 * 1024 * 1024


def _largest_divisor_tile(total, cap):
    """Largest multiple of 8 that divides `total` (a multiple of 8) and is <= cap."""
    cap = max(_OC_CHUNK, min(cap, total))
    best = _OC_CHUNK
    for d in range(_OC_CHUNK, cap + 1, _OC_CHUNK):
        if total % d == 0:
            best = d
    return best


def _choose_tiles(B, cin, cout, m, x_itemsize, w_itemsize):
    """Generation-aware tile sizing (v5e/v6e: 128 MiB VMEM, v7x: 64 MiB)."""
    vmem_cap = _vmem_capacity_bytes()
    vmem_limit = (vmem_cap * 3) // 4          # scoped VMEM limit we request
    budget = (vmem_limit * 7) // 10           # headroom for compiler scratch

    # Cin tile: at most _MAX_TCI rows per grid step; remainder -> reduction grid axis.
    # (t_ci must be a multiple of 8 or equal the full padded Cin: (8,128) block rule.)
    if cin <= _MAX_TCI:
        t_ci, cin_p = cin, cin
    else:
        t_ci, cin_p = _MAX_TCI, _round_up(cin, _MAX_TCI)

    cout_p = _round_up(cout, _OC_CHUNK)
    t_co = _largest_divisor_tile(cout_p, _MAX_TCO)

    def bytes_per_lane(tco):
        x_b = B * 2 * t_ci * x_itemsize       # (B, 2, tCin, tM) block
        w_b = 2 * t_ci * tco * w_itemsize     # (2, tCin, tCout, tM) block
        o_b = B * 2 * tco * 4                 # (B, 2, tCout, tM) f32 output block
        return 2 * (x_b + w_b + o_b)          # x2 double buffering

    # Shrink the Cout tile until at least a 128-lane M tile fits the budget.
    while t_co > _OC_CHUNK and budget // bytes_per_lane(t_co) < _LANE:
        t_co = _largest_divisor_tile(cout_p, t_co // 2)

    tm_cap = (budget // bytes_per_lane(t_co)) // _LANE * _LANE
    tm_cap = max(_LANE, min(_MAX_TM, tm_cap))

    # Even M tiling: num_m_tiles = ceil(m128 / cap), tM = round_up(ceil(m128/n), 128)
    # -> padding per tile < 128 lanes (instead of up to tM-128 with round_up(M, tM)).
    m128 = _round_up(m, _LANE)
    n_mt = -(-m128 // tm_cap)
    tM = _round_up(-(-m128 // n_mt), _LANE)
    Mpad = n_mt * tM

    # v7x megacore: make sure there are enough parallel grid points for 2 TensorCores
    # (8 corners alone is only 4 per core); split Cout further while it stays >= 8.
    while 8 * (cout_p // t_co) * n_mt < 16 and t_co > _OC_CHUNK:
        t_co = _largest_divisor_tile(cout_p, t_co // 2)

    return t_ci, cin_p, t_co, cout_p, tM, Mpad, n_mt, vmem_limit


# ----------------------------------------------------------------------------
# Pallas kernel: one (corner, Cout-tile, M-tile, Cin-tile) grid step.
#   x_ref : (B, 2, tCin, tM)      stream dtype (f32 or bf16)   [2 = re/im]
#   w_ref : (2, tCin, tCout, tM)  stream dtype
#   o_ref : (B, 2, tCout, tM)     f32; same block across the Cin grid axis -> accumulator
# ----------------------------------------------------------------------------
def _corner_mul_kernel(x_ref, w_ref, o_ref):
    B = x_ref.shape[0]
    t_ci = x_ref.shape[2]
    t_co = w_ref.shape[2]
    n_oc = t_co // _OC_CHUNK

    # Zero-init the resident output block on the first Cin step (P3 pattern).
    @pl.when(pl.program_id(3) == 0)
    def _init():
        o_ref[...] = jnp.zeros_like(o_ref)

    def accumulate_batch(b, carry):
        for oc in range(n_oc):
            cs = pl.ds(oc * _OC_CHUNK, _OC_CHUNK)
            # Accumulators are (8, tM) f32 -> vreg resident; the VMEM-resident output
            # block is read/written exactly once per (b, cout-chunk) per grid step.
            acc_re = o_ref[b, 0, cs, :]
            acc_im = o_ref[b, 1, cs, :]
            for i in range(t_ci):              # Cin innermost, bounded unroll (<= 8)
                # (1, tM) x row; the single-sublane -> 8-sublane expand happens inside
                # the multiplies (cheap, off the VALU slot).  Weights are upcast from
                # the streaming dtype; accumulation stays f32.
                xr = x_ref[b, 0, pl.ds(i, 1), :].astype(jnp.float32)
                xi = x_ref[b, 1, pl.ds(i, 1), :].astype(jnp.float32)
                wr = w_ref[0, i, cs, :].astype(jnp.float32)
                wi = w_ref[1, i, cs, :].astype(jnp.float32)
                acc_re = acc_re + (xr * wr - xi * wi)
                acc_im = acc_im + (xr * wi + xi * wr)
            o_ref[b, 0, cs, :] = acc_re
            o_ref[b, 1, cs, :] = acc_im
        return carry

    # Bound trace/compile size: small problems unroll statically, large batches use a
    # fori_loop over b (dynamic first-axis indexing on the refs).
    if B * n_oc * t_ci <= 256:
        for b in range(B):
            accumulate_batch(b, 0)
    else:
        jax.lax.fori_loop(0, B, accumulate_batch, 0)


def corner_mul_pallas(xs, ws, cin, cout, m, stream_dtype):
    """xs: (8, B, 2, Cin, M) f32, ws: (8, 2, Cin, Cout, M) f32
    -> (8, B, 2, Cout_p, Mpad) f32 (re/im on axis 2; padded rows/lanes are zero)."""
    n_corner, B = xs.shape[0], xs.shape[1]
    sdt = jnp.dtype(stream_dtype)

    (t_ci, cin_p, t_co, cout_p, tM, Mpad, n_mt, vmem_limit) = _choose_tiles(
        B, cin, cout, m, sdt.itemsize, sdt.itemsize)

    # Cast to the streaming dtype and zero-pad (padded x/w entries are zero ->
    # padded outputs are zero and are sliced off by the caller).
    xs = jnp.pad(xs.astype(sdt),
                 ((0, 0), (0, 0), (0, 0), (0, cin_p - cin), (0, Mpad - m)))
    ws = jnp.pad(ws.astype(sdt),
                 ((0, 0), (0, 0), (0, cin_p - cin), (0, cout_p - cout), (0, Mpad - m)))

    n_co = cout_p // t_co
    n_ci = cin_p // t_ci
    grid = (n_corner, n_co, n_mt, n_ci)        # reduction (Cin) axis last / innermost

    x_spec = pl.BlockSpec((None, B, 2, t_ci, tM), lambda c, j, t, k: (c, 0, 0, k, t))
    w_spec = pl.BlockSpec((None, 2, t_ci, t_co, tM), lambda c, j, t, k: (c, 0, k, j, t))
    o_spec = pl.BlockSpec((None, B, 2, t_co, tM), lambda c, j, t, k: (c, 0, 0, j, t))

    return pl.pallas_call(
        _corner_mul_kernel,
        out_shape=jax.ShapeDtypeStruct((n_corner, B, 2, cout_p, Mpad), jnp.float32),
        grid_spec=pltpu.PrefetchScalarGridSpec(
            num_scalar_prefetch=0,
            grid=grid,
            in_specs=[x_spec, w_spec],
            out_specs=o_spec,
        ),
        compiler_params=pltpu.CompilerParams(
            dimension_semantics=("parallel", "parallel", "parallel", "arbitrary"),
            vmem_limit_bytes=int(vmem_limit),
        ),
    )(xs, ws)


# ----------------------------------------------------------------------------
# FFT glue (plain JAX): rfft on the last axis + one rank-3 fftn over the rest
# (stays within the XLA:TPU FFT rank limit).
# ----------------------------------------------------------------------------
def rfft4(x):
    return jnp.fft.fftn(jnp.fft.rfft(x, axis=-1), axes=(-4, -3, -2))


def irfft4(xf, sizes):
    return jnp.fft.irfft(jnp.fft.ifftn(xf, axes=(-4, -3, -2)), n=sizes[-1], axis=-1)


def _corner_slices(D1, D2, D3, m1, m2, m3, m4):
    lo1, hi1 = slice(0, m1), slice(D1 - m1, D1)
    lo2, hi2 = slice(0, m2), slice(D2 - m2, D2)
    lo3, hi3 = slice(0, m3), slice(D3 - m3, D3)
    lo4 = slice(0, m4)
    # Same ordering as weights1..weights8 in the PyTorch module.
    return [
        (lo1, lo2, lo3, lo4),
        (hi1, lo2, lo3, lo4),
        (lo1, hi2, lo3, lo4),
        (lo1, lo2, hi3, lo4),
        (hi1, hi2, lo3, lo4),
        (hi1, lo2, hi3, lo4),
        (lo1, hi2, hi3, lo4),
        (hi1, hi2, hi3, lo4),
    ]


# ----------------------------------------------------------------------------
# Module forward.
# ----------------------------------------------------------------------------
@functools.partial(jax.jit, static_argnames=("modes", "stream_dtype"))
def factorized_spectral_conv4d(x, weights, modes, stream_dtype="float32"):
    """x: (B, Cin, D1..D4) f32; weights: (8, Cin, Cout, m1..m4, 2) f32."""
    m1, m2, m3, m4 = modes
    B, Cin, D1, D2, D3, D4 = x.shape
    Cout = weights.shape[2]
    M = m1 * m2 * m3 * m4

    x_ft = rfft4(x)                                       # (B, Cin, D1, D2, D3, D4//2+1)
    corners = _corner_slices(D1, D2, D3, m1, m2, m3, m4)

    # Gather the 8 corner blocks (corner-sized data only), flatten modes onto lanes,
    # and pack re/im on one small axis -> a single input stream per operand.
    xs_c = jnp.stack(
        [x_ft[:, :, s1, s2, s3, s4].reshape(B, Cin, M) for (s1, s2, s3, s4) in corners],
        axis=0,
    )                                                     # (8, B, Cin, M) complex64
    xs = jnp.stack([jnp.real(xs_c), jnp.imag(xs_c)], axis=2)   # (8, B, 2, Cin, M) f32

    # Weights: (8, Cin, Cout, M, 2) -> (8, 2, Cin, Cout, M).  (In a real model this
    # transpose/pad would be done once at parameter load time, not per forward.)
    ws = jnp.moveaxis(weights.reshape(8, Cin, Cout, M, 2), -1, 1)

    out = corner_mul_pallas(xs, ws, Cin, Cout, M, stream_dtype)   # (8, B, 2, Cout_p, Mpad)
    o_c = jax.lax.complex(out[:, :, 0, :Cout, :M], out[:, :, 1, :Cout, :M])
    o_c = o_c.reshape(8, B, Cout, m1, m2, m3, m4)

    # Scatter the 8 corner results into the zero-initialized spectrum.
    # (If 2*m_k > D_k corners overlap and later writes win, same as PyTorch.)
    out_ft = jnp.zeros((B, Cout, D1, D2, D3, D4 // 2 + 1), dtype=jnp.complex64)
    for k, (s1, s2, s3, s4) in enumerate(corners):
        out_ft = out_ft.at[:, :, s1, s2, s3, s4].set(o_c[k])

    return irfft4(out_ft, (D1, D2, D3, D4))               # (B, Cout, D1, D2, D3, D4) f32


# ----------------------------------------------------------------------------
# Pure-JAX reference (used to sanity-check the kernel).
# ----------------------------------------------------------------------------
def _reference(x, weights, modes):
    m1, m2, m3, m4 = modes
    B, Cin, D1, D2, D3, D4 = x.shape
    Cout = weights.shape[2]
    x_ft = rfft4(x)
    w_c = (weights[..., 0] + 1j * weights[..., 1]).astype(jnp.complex64)
    out_ft = jnp.zeros((B, Cout, D1, D2, D3, D4 // 2 + 1), dtype=jnp.complex64)
    for k, (s1, s2, s3, s4) in enumerate(_corner_slices(D1, D2, D3, m1, m2, m3, m4)):
        inp = x_ft[:, :, s1, s2, s3, s4]                   # (B, Cin, m1, m2, m3, m4)
        prod = jnp.sum(inp[:, :, None] * w_c[k][None], axis=1)
        out_ft = out_ft.at[:, :, s1, s2, s3, s4].set(prod)
    return irfft4(out_ft, (D1, D2, D3, D4))


if __name__ == "__main__":
    # Small, deterministic problem.
    B, Cin, Cout = 2, 4, 4
    D1, D2, D3, D4 = 8, 8, 8, 8
    modes = (2, 2, 2, 3)                                   # modes4 <= D4//2 + 1 = 5

    key = jax.random.PRNGKey(0)
    kx, kw = jax.random.split(key)
    x = jax.random.normal(kx, (B, Cin, D1, D2, D3, D4), dtype=jnp.float32)

    scale = 1.0 / (Cin * Cout)
    # 8 dense weight tensors (weights1..weights8), init like reset_parameters().
    weights = scale * jax.random.normal(
        kw, (8, Cin, Cout, *modes, 2), dtype=jnp.float32
    )

    # f32 streaming path: tight check against the pure-JAX reference.
    out = jax.block_until_ready(factorized_spectral_conv4d(x, weights, modes))
    ref = jax.block_until_ready(_reference(x, weights, modes))
    np.testing.assert_allclose(np.asarray(out), np.asarray(ref), rtol=1e-4, atol=1e-5)
    assert out.shape == (B, Cout, D1, D2, D3, D4)
    assert out.dtype == jnp.float32

    # bf16 streaming path (halves HBM traffic / per-tile VMEM): loose check.
    out_bf16 = jax.block_until_ready(
        factorized_spectral_conv4d(x, weights, modes, stream_dtype="bfloat16")
    )
    ref_np = np.asarray(ref)
    rel = np.linalg.norm(np.asarray(out_bf16) - ref_np) / np.linalg.norm(ref_np)
    assert rel < 5e-2, f"bf16 streaming path relative error too large: {rel}"

    print("KERNEL_OK")
</pallas_src>

<mosaic_0001>
module attributes {stable_mosaic.version = 11 : i64} {
  func.func @_corner_mul_kernel(%arg0: i32, %arg1: i32, %arg2: i32, %arg3: i32, %arg4: memref<1x2x2x4x128xf32, #tpu.memory_space<vmem>>, %arg5: memref<1x2x4x8x128xf32, #tpu.memory_space<vmem>>, %arg6: memref<1x2x2x8x128xf32, #tpu.memory_space<vmem>>) attributes {dimension_semantics = [#tpu.dimension_semantics<parallel>, #tpu.dimension_semantics<parallel>, #tpu.dimension_semantics<parallel>, #tpu.dimension_semantics<arbitrary>], iteration_bounds = array<i64: 8, 1, 1, 1>, scalar_prefetch = 0 : i64, scratch_operands = 0 : i64, tpu.core_type = #tpu.core_type<tc>, window_params = [{transform_indices = @transform_0, window_bounds = array<i64: 1, 2, 2, 4, 128>}, {transform_indices = @transform_1, window_bounds = array<i64: 1, 2, 4, 8, 128>}, {transform_indices = @transform_2, window_bounds = array<i64: 1, 2, 2, 8, 128>}]} {
    %c0_i32 = arith.constant 0 : i32
    %0 = arith.cmpi eq, %arg3, %c0_i32 : i32
    %1 = arith.extui %0 : i1 to i32
    %c0_i32_0 = arith.constant 0 : i32
    %2 = arith.cmpi ne, %1, %c0_i32_0 : i32
    scf.if %2 {
      %cst = arith.constant 0.000000e+00 : f32
      %183 = vector.broadcast %cst : f32 to vector<2x2x8x128xf32>
      %c0_197 = arith.constant 0 : index
      %c0_198 = arith.constant 0 : index
      %c0_199 = arith.constant 0 : index
      %c0_200 = arith.constant 0 : index
      %c0_201 = arith.constant 0 : index
      %184 = vector.load %arg6[%c0_197, %c0_198, %c0_199, %c0_200, %c0_201] : memref<1x2x2x8x128xf32, #tpu.memory_space<vmem>>, vector<1x2x2x8x128xf32>
      %185 = vector.shape_cast %184 : vector<1x2x2x8x128xf32> to vector<2x2x8x128xf32>
      %186 = vector.shape_cast %183 : vector<2x2x8x128xf32> to vector<1x2x2x8x128xf32>
      tpu.vector_store %arg6[%c0_197, %c0_198, %c0_199, %c0_200, %c0_201], %186 {strides = array<i32>} : memref<1x2x2x8x128xf32, #tpu.memory_space<vmem>>, vector<1x2x2x8x128xf32>,
    } else {
    }
    %c0 = arith.constant 0 : index
    %c0_1 = arith.constant 0 : index
    %c0_2 = arith.constant 0 : index
    %c0_3 = arith.constant 0 : index
    %c0_4 = arith.constant 0 : index
    %3 = vector.load %arg6[%c0, %c0_1, %c0_2, %c0_3, %c0_4] : memref<1x2x2x8x128xf32, #tpu.memory_space<vmem>>, vector<1x1x1x8x128xf32>
    %4 = vector.shape_cast %3 : vector<1x1x1x8x128xf32> to vector<8x128xf32>
    %c0_5 = arith.constant 0 : index
    %c0_6 = arith.constant 0 : index
    %c1 = arith.constant 1 : index
    %c0_7 = arith.constant 0 : index
    %c0_8 = arith.constant 0 : index
    %5 = vector.load %arg6[%c0_5, %c0_6, %c1, %c0_7, %c0_8] : memref<1x2x2x8x128xf32, #tpu.memory_space<vmem>>, vector<1x1x1x8x128xf32>
    %6 = vector.shape_cast %5 : vector<1x1x1x8x128xf32> to vector<8x128xf32>
    %c0_9 = arith.constant 0 : index
    %c0_10 = arith.constant 0 : index
    %c0_11 = arith.constant 0 : index
    %c0_12 = arith.constant 0 : index
    %c0_13 = arith.constant 0 : index
    %7 = vector.load %arg4[%c0_9, %c0_10, %c0_11, %c0_12, %c0_13] : memref<1x2x2x4x128xf32, #tpu.memory_space<vmem>>, vector<1x1x1x1x128xf32>
    %8 = vector.shape_cast %7 : vector<1x1x1x1x128xf32> to vector<1x128xf32>
    %c0_14 = arith.constant 0 : index
    %c0_15 = arith.constant 0 : index
    %c1_16 = arith.constant 1 : index
    %c0_17 = arith.constant 0 : index
    %c0_18 = arith.constant 0 : index
    %9 = vector.load %arg4[%c0_14, %c0_15, %c1_16, %c0_17, %c0_18] : memref<1x2x2x4x128xf32, #tpu.memory_space<vmem>>, vector<1x1x1x1x128xf32>
    %10 = vector.shape_cast %9 : vector<1x1x1x1x128xf32> to vector<1x128xf32>
    %c0_19 = arith.constant 0 : index
    %c0_20 = arith.constant 0 : index
    %c0_21 = arith.constant 0 : index
    %c0_22 = arith.constant 0 : index
    %c0_23 = arith.constant 0 : index
    %11 = vector.load %arg5[%c0_19, %c0_20, %c0_21, %c0_22, %c0_23] : memref<1x2x4x8x128xf32, #tpu.memory_space<vmem>>, vector<1x1x1x8x128xf32>
    %12 = vector.shape_cast %11 : vector<1x1x1x8x128xf32> to vector<8x128xf32>
    %c0_24 = arith.constant 0 : index
    %c1_25 = arith.constant 1 : index
    %c0_26 = arith.constant 0 : index
    %c0_27 = arith.constant 0 : index
    %c0_28 = arith.constant 0 : index
    %13 = vector.load %arg5[%c0_24, %c1_25, %c0_26, %c0_27, %c0_28] : memref<1x2x4x8x128xf32, #tpu.memory_space<vmem>>, vector<1x1x1x8x128xf32>
    %14 = vector.shape_cast %13 : vector<1x1x1x8x128xf32> to vector<8x128xf32>
    %15 = vector.broadcast %8 : vector<1x128xf32> to vector<8x128xf32>
    %16 = arith.mulf %15, %12 : vector<8x128xf32>
    %17 = vector.broadcast %10 : vector<1x128xf32> to vector<8x128xf32>
    %18 = arith.mulf %17, %14 : vector<8x128xf32>
    %19 = arith.subf %16, %18 : vector<8x128xf32>
    %20 = arith.addf %4, %19 : vector<8x128xf32>
    %21 = vector.broadcast %8 : vector<1x128xf32> to vector<8x128xf32>
    %22 = arith.mulf %21, %14 : vector<8x128xf32>
    %23 = vector.broadcast %10 : vector<1x128xf32> to vector<8x128xf32>
    %24 = arith.mulf %23, %12 : vector<8x128xf32>
    %25 = arith.addf %22, %24 : vector<8x128xf32>
    %26 = arith.addf %6, %25 : vector<8x128xf32>
    %c0_29 = arith.constant 0 : index
    %c0_30 = arith.constant 0 : index
    %c0_31 = arith.constant 0 : index
    %c1_32 = arith.constant 1 : index
    %c0_33 = arith.constant 0 : index
    %27 = vector.load %arg4[%c0_29, %c0_30, %c0_31, %c1_32, %c0_33] : memref<1x2x2x4x128xf32, #tpu.memory_space<vmem>>, vector<1x1x1x1x128xf32>
    %28 = vector.shape_cast %27 : vector<1x1x1x1x128xf32> to vector<1x128xf32>
    %c0_34 = arith.constant 0 : index
    %c0_35 = arith.constant 0 : index
    %c1_36 = arith.constant 1 : index
    %c1_37 = arith.constant 1 : index
    %c0_38 = arith.constant 0 : index
    %29 = vector.load %arg4[%c0_34, %c0_35, %c1_36, %c1_37, %c0_38] : memref<1x2x2x4x128xf32, #tpu.memory_space<vmem>>, vector<1x1x1x1x128xf32>
    %30 = vector.shape_cast %29 : vector<1x1x1x1x128xf32> to vector<1x128xf32>
    %c0_39 = arith.constant 0 : index
    %c0_40 = arith.constant 0 : index
    %c1_41 = arith.constant 1 : index
    %c0_42 = arith.constant 0 : index
    %c0_43 = arith.constant 0 : index
    %31 = vector.load %arg5[%c0_39, %c0_40, %c1_41, %c0_42, %c0_43] : memref<1x2x4x8x128xf32, #tpu.memory_space<vmem>>, vector<1x1x1x8x128xf32>
    %32 = vector.shape_cast %31 : vector<1x1x1x8x128xf32> to vector<8x128xf32>
    %c0_44 = arith.constant 0 : index
    %c1_45 = arith.constant 1 : index
    %c1_46 = arith.constant 1 : index
    %c0_47 = arith.constant 0 : index
    %c0_48 = arith.constant 0 : index
    %33 = vector.load %arg5[%c0_44, %c1_45, %c1_46, %c0_47, %c0_48] : memref<1x2x4x8x128xf32, #tpu.memory_space<vmem>>, vector<1x1x1x8x128xf32>
    %34 = vector.shape_cast %33 : vector<1x1x1x8x128xf32> to vector<8x128xf32>
    %35 = vector.broadcast %28 : vector<1x128xf32> to vector<8x128xf32>
    %36 = arith.mulf %35, %32 : vector<8x128xf32>
    %37 = vector.broadcast %30 : vector<1x128xf32> to vector<8x128xf32>
    %38 = arith.mulf %37, %34 : vector<8x128xf32>
    %39 = arith.subf %36, %38 : vector<8x128xf32>
    %40 = arith.addf %20, %39 : vector<8x128xf32>
    %41 = vector.broadcast %28 : vector<1x128xf32> to vector<8x128xf32>
    %42 = arith.mulf %41, %34 : vector<8x128xf32>
    %43 = vector.broadcast %30 : vector<1x128xf32> to vector<8x128xf32>
    %44 = arith.mulf %43, %32 : vector<8x128xf32>
    %45 = arith.addf %42, %44 : vector<8x128xf32>
    %46 = arith.addf %26, %45 : vector<8x128xf32>
    %c0_49 = arith.constant 0 : index
    %c0_50 = arith.constant 0 : index
    %c0_51 = arith.constant 0 : index
    %c2 = arith.constant 2 : index
    %c0_52 = arith.constant 0 : index
    %47 = vector.load %arg4[%c0_49, %c0_50, %c0_51, %c2, %c0_52] : memref<1x2x2x4x128xf32, #tpu.memory_space<vmem>>, vector<1x1x1x1x128xf32>
    %48 = vector.shape_cast %47 : vector<1x1x1x1x128xf32> to vector<1x128xf32>
    %c0_53 = arith.constant 0 : index
    %c0_54 = arith.constant 0 : index
    %c1_55 = arith.constant 1 : index
    %c2_56 = arith.constant 2 : index
    %c0_57 = arith.constant 0 : index
    %49 = vector.load %arg4[%c0_53, %c0_54, %c1_55, %c2_56, %c0_57] : memref<1x2x2x4x128xf32, #tpu.memory_space<vmem>>, vector<1x1x1x1x128xf32>
    %50 = vector.shape_cast %49 : vector<1x1x1x1x128xf32> to vector<1x128xf32>
    %c0_58 = arith.constant 0 : index
    %c0_59 = arith.constant 0 : index
    %c2_60 = arith.constant 2 : index
    %c0_61 = arith.constant 0 : index
    %c0_62 = arith.constant 0 : index
    %51 = vector.load %arg5[%c0_58, %c0_59, %c2_60, %c0_61, %c0_62] : memref<1x2x4x8x128xf32, #tpu.memory_space<vmem>>, vector<1x1x1x8x128xf32>
    %52 = vector.shape_cast %51 : vector<1x1x1x8x128xf32> to vector<8x128xf32>
    %c0_63 = arith.constant 0 : index
    %c1_64 = arith.constant 1 : index
    %c2_65 = arith.constant 2 : index
    %c0_66 = arith.constant 0 : index
    %c0_67 = arith.constant 0 : index
    %53 = vector.load %arg5[%c0_63, %c1_64, %c2_65, %c0_66, %c0_67] : memref<1x2x4x8x128xf32, #tpu.memory_space<vmem>>, vector<1x1x1x8x128xf32>
    %54 = vector.shape_cast %53 : vector<1x1x1x8x128xf32> to vector<8x128xf32>
    %55 = vector.broadcast %48 : vector<1x128xf32> to vector<8x128xf32>
    %56 = arith.mulf %55, %52 : vector<8x128xf32>
    %57 = vector.broadcast %50 : vector<1x128xf32> to vector<8x128xf32>
    %58 = arith.mulf %57, %54 : vector<8x128xf32>
    %59 = arith.subf %56, %58 : vector<8x128xf32>
    %60 = arith.addf %40, %59 : vector<8x128xf32>
    %61 = vector.broadcast %48 : vector<1x128xf32> to vector<8x128xf32>
    %62 = arith.mulf %61, %54 : vector<8x128xf32>
    %63 = vector.broadcast %50 : vector<1x128xf32> to vector<8x128xf32>
    %64 = arith.mulf %63, %52 : vector<8x128xf32>
    %65 = arith.addf %62, %64 : vector<8x128xf32>
    %66 = arith.addf %46, %65 : vector<8x128xf32>
    %c0_68 = arith.constant 0 : index
    %c0_69 = arith.constant 0 : index
    %c0_70 = arith.constant 0 : index
    %c3 = arith.constant 3 : index
    %c0_71 = arith.constant 0 : index
    %67 = vector.load %arg4[%c0_68, %c0_69, %c0_70, %c3, %c0_71] : memref<1x2x2x4x128xf32, #tpu.memory_space<vmem>>, vector<1x1x1x1x128xf32>
    %68 = vector.shape_cast %67 : vector<1x1x1x1x128xf32> to vector<1x128xf32>
    %c0_72 = arith.constant 0 : index
    %c0_73 = arith.constant 0 : index
    %c1_74 = arith.constant 1 : index
    %c3_75 = arith.constant 3 : index
    %c0_76 = arith.constant 0 : index
    %69 = vector.load %arg4[%c0_72, %c0_73, %c1_74, %c3_75, %c0_76] : memref<1x2x2x4x128xf32, #tpu.memory_space<vmem>>, vector<1x1x1x1x128xf32>
    %70 = vector.shape_cast %69 : vector<1x1x1x1x128xf32> to vector<1x128xf32>
    %c0_77 = arith.constant 0 : index
    %c0_78 = arith.constant 0 : index
    %c3_79 = arith.constant 3 : index
    %c0_80 = arith.constant 0 : index
    %c0_81 = arith.constant 0 : index
    %71 = vector.load %arg5[%c0_77, %c0_78, %c3_79, %c0_80, %c0_81] : memref<1x2x4x8x128xf32, #tpu.memory_space<vmem>>, vector<1x1x1x8x128xf32>
    %72 = vector.shape_cast %71 : vector<1x1x1x8x128xf32> to vector<8x128xf32>
    %c0_82 = arith.constant 0 : index
    %c1_83 = arith.constant 1 : index
    %c3_84 = arith.constant 3 : index
    %c0_85 = arith.constant 0 : index
    %c0_86 = arith.constant 0 : index
    %73 = vector.load %arg5[%c0_82, %c1_83, %c3_84, %c0_85, %c0_86] : memref<1x2x4x8x128xf32, #tpu.memory_space<vmem>>, vector<1x1x1x8x128xf32>
    %74 = vector.shape_cast %73 : vector<1x1x1x8x128xf32> to vector<8x128xf32>
    %75 = vector.broadcast %68 : vector<1x128xf32> to vector<8x128xf32>
    %76 = arith.mulf %75, %72 : vector<8x128xf32>
    %77 = vector.broadcast %70 : vector<1x128xf32> to vector<8x128xf32>
    %78 = arith.mulf %77, %74 : vector<8x128xf32>
    %79 = arith.subf %76, %78 : vector<8x128xf32>
    %80 = arith.addf %60, %79 : vector<8x128xf32>
    %81 = vector.broadcast %68 : vector<1x128xf32> to vector<8x128xf32>
    %82 = arith.mulf %81, %74 : vector<8x128xf32>
    %83 = vector.broadcast %70 : vector<1x128xf32> to vector<8x128xf32>
    %84 = arith.mulf %83, %72 : vector<8x128xf32>
    %85 = arith.addf %82, %84 : vector<8x128xf32>
    %86 = arith.addf %66, %85 : vector<8x128xf32>
    %c0_87 = arith.constant 0 : index
    %c0_88 = arith.constant 0 : index
    %c0_89 = arith.constant 0 : index
    %c0_90 = arith.constant 0 : index
    %c0_91 = arith.constant 0 : index
    %87 = vector.load %arg6[%c0_87, %c0_88, %c0_89, %c0_90, %c0_91] : memref<1x2x2x8x128xf32, #tpu.memory_space<vmem>>, vector<1x1x1x8x128xf32>
    %88 = vector.shape_cast %87 : vector<1x1x1x8x128xf32> to vector<8x128xf32>
    %89 = vector.shape_cast %80 : vector<8x128xf32> to vector<1x1x1x8x128xf32>
    tpu.vector_store %arg6[%c0_87, %c0_88, %c0_89, %c0_90, %c0_91], %89 {strides = array<i32>} : memref<1x2x2x8x128xf32, #tpu.memory_space<vmem>>, vector<1x1x1x8x128xf32>,
    %c0_92 = arith.constant 0 : index
    %c0_93 = arith.constant 0 : index
    %c1_94 = arith.constant 1 : index
    %c0_95 = arith.constant 0 : index
    %c0_96 = arith.constant 0 : index
    %90 = vector.load %arg6[%c0_92, %c0_93, %c1_94, %c0_95, %c0_96] : memref<1x2x2x8x128xf32, #tpu.memory_space<vmem>>, vector<1x1x1x8x128xf32>
    %91 = vector.shape_cast %90 : vector<1x1x1x8x128xf32> to vector<8x128xf32>
    %92 = vector.shape_cast %86 : vector<8x128xf32> to vector<1x1x1x8x128xf32>
    tpu.vector_store %arg6[%c0_92, %c0_93, %c1_94, %c0_95, %c0_96], %92 {strides = array<i32>} : memref<1x2x2x8x128xf32, #tpu.memory_space<vmem>>, vector<1x1x1x8x128xf32>,
    %c0_97 = arith.constant 0 : index
    %c1_98 = arith.constant 1 : index
    %c0_99 = arith.constant 0 : index
    %c0_100 = arith.constant 0 : index
    %c0_101 = arith.constant 0 : index
    %93 = vector.load %arg6[%c0_97, %c1_98, %c0_99, %c0_100, %c0_101] : memref<1x2x2x8x128xf32, #tpu.memory_space<vmem>>, vector<1x1x1x8x128xf32>
    %94 = vector.shape_cast %93 : vector<1x1x1x8x128xf32> to vector<8x128xf32>
    %c0_102 = arith.constant 0 : index
    %c1_103 = arith.constant 1 : index
    %c1_104 = arith.constant 1 : index
    %c0_105 = arith.constant 0 : index
    %c0_106 = arith.constant 0 : index
    %95 = vector.load %arg6[%c0_102, %c1_103, %c1_104, %c0_105, %c0_106] : memref<1x2x2x8x128xf32, #tpu.memory_space<vmem>>, vector<1x1x1x8x128xf32>
    %96 = vector.shape_cast %95 : vector<1x1x1x8x128xf32> to vector<8x128xf32>
    %c0_107 = arith.constant 0 : index
    %c1_108 = arith.constant 1 : index
    %c0_109 = arith.constant 0 : index
    %c0_110 = arith.constant 0 : index
    %c0_111 = arith.constant 0 : index
    %97 = vector.load %arg4[%c0_107, %c1_108, %c0_109, %c0_110, %c0_111] : memref<1x2x2x4x128xf32, #tpu.memory_space<vmem>>, vector<1x1x1x1x128xf32>
    %98 = vector.shape_cast %97 : vector<1x1x1x1x128xf32> to vector<1x128xf32>
    %c0_112 = arith.constant 0 : index
    %c1_113 = arith.constant 1 : index
    %c1_114 = arith.constant 1 : index
    %c0_115 = arith.constant 0 : index
    %c0_116 = arith.constant 0 : index
    %99 = vector.load %arg4[%c0_112, %c1_113, %c1_114, %c0_115, %c0_116] : memref<1x2x2x4x128xf32, #tpu.memory_space<vmem>>, vector<1x1x1x1x128xf32>
    %100 = vector.shape_cast %99 : vector<1x1x1x1x128xf32> to vector<1x128xf32>
    %c0_117 = arith.constant 0 : index
    %c0_118 = arith.constant 0 : index
    %c0_119 = arith.constant 0 : index
    %c0_120 = arith.constant 0 : index
    %c0_121 = arith.constant 0 : index
    %101 = vector.load %arg5[%c0_117, %c0_118, %c0_119, %c0_120, %c0_121] : memref<1x2x4x8x128xf32, #tpu.memory_space<vmem>>, vector<1x1x1x8x128xf32>
    %102 = vector.shape_cast %101 : vector<1x1x1x8x128xf32> to vector<8x128xf32>
    %c0_122 = arith.constant 0 : index
    %c1_123 = arith.constant 1 : index
    %c0_124 = arith.constant 0 : index
    %c0_125 = arith.constant 0 : index
    %c0_126 = arith.constant 0 : index
    %103 = vector.load %arg5[%c0_122, %c1_123, %c0_124, %c0_125, %c0_126] : memref<1x2x4x8x128xf32, #tpu.memory_space<vmem>>, vector<1x1x1x8x128xf32>
    %104 = vector.shape_cast %103 : vector<1x1x1x8x128xf32> to vector<8x128xf32>
    %105 = vector.broadcast %98 : vector<1x128xf32> to vector<8x128xf32>
    %106 = arith.mulf %105, %102 : vector<8x128xf32>
    %107 = vector.broadcast %100 : vector<1x128xf32> to vector<8x128xf32>
    %108 = arith.mulf %107, %104 : vector<8x128xf32>
    %109 = arith.subf %106, %108 : vector<8x128xf32>
    %110 = arith.addf %94, %109 : vector<8x128xf32>
    %111 = vector.broadcast %98 : vector<1x128xf32> to vector<8x128xf32>
    %112 = arith.mulf %111, %104 : vector<8x128xf32>
    %113 = vector.broadcast %100 : vector<1x128xf32> to vector<8x128xf32>
    %114 = arith.mulf %113, %102 : vector<8x128xf32>
    %115 = arith.addf %112, %114 : vector<8x128xf32>
    %116 = arith.addf %96, %115 : vector<8x128xf32>
    %c0_127 = arith.constant 0 : index
    %c1_128 = arith.constant 1 : index
    %c0_129 = arith.constant 0 : index
    %c1_130 = arith.constant 1 : index
    %c0_131 = arith.constant 0 : index
    %117 = vector.load %arg4[%c0_127, %c1_128, %c0_129, %c1_130, %c0_131] : memref<1x2x2x4x128xf32, #tpu.memory_space<vmem>>, vector<1x1x1x1x128xf32>
    %118 = vector.shape_cast %117 : vector<1x1x1x1x128xf32> to vector<1x128xf32>
    %c0_132 = arith.constant 0 : index
    %c1_133 = arith.constant 1 : index
    %c1_134 = arith.constant 1 : index
    %c1_135 = arith.constant 1 : index
    %c0_136 = arith.constant 0 : index
    %119 = vector.load %arg4[%c0_132, %c1_133, %c1_134, %c1_135, %c0_136] : memref<1x2x2x4x128xf32, #tpu.memory_space<vmem>>, vector<1x1x1x1x128xf32>
    %120 = vector.shape_cast %119 : vector<1x1x1x1x128xf32> to vector<1x128xf32>
    %c0_137 = arith.constant 0 : index
    %c0_138 = arith.constant 0 : index
    %c1_139 = arith.constant 1 : index
    %c0_140 = arith.constant 0 : index
    %c0_141 = arith.constant 0 : index
    %121 = vector.load %arg5[%c0_137, %c0_138, %c1_139, %c0_140, %c0_141] : memref<1x2x4x8x128xf32, #tpu.memory_space<vmem>>, vector<1x1x1x8x128xf32>
    %122 = vector.shape_cast %121 : vector<1x1x1x8x128xf32> to vector<8x128xf32>
    %c0_142 = arith.constant 0 : index
    %c1_143 = arith.constant 1 : index
    %c1_144 = arith.constant 1 : index
    %c0_145 = arith.constant 0 : index
    %c0_146 = arith.constant 0 : index
    %123 = vector.load %arg5[%c0_142, %c1_143, %c1_144, %c0_145, %c0_146] : memref<1x2x4x8x128xf32, #tpu.memory_space<vmem>>, vector<1x1x1x8x128xf32>
    %124 = vector.shape_cast %123 : vector<1x1x1x8x128xf32> to vector<8x128xf32>
    %125 = vector.broadcast %118 : vector<1x128xf32> to vector<8x128xf32>
    %126 = arith.mulf %125, %122 : vector<8x128xf32>
    %127 = vector.broadcast %120 : vector<1x128xf32> to vector<8x128xf32>
    %128 = arith.mulf %127, %124 : vector<8x128xf32>
    %129 = arith.subf %126, %128 : vector<8x128xf32>
    %130 = arith.addf %110, %129 : vector<8x128xf32>
    %131 = vector.broadcast %118 : vector<1x128xf32> to vector<8x128xf32>
    %132 = arith.mulf %131, %124 : vector<8x128xf32>
    %133 = vector.broadcast %120 : vector<1x128xf32> to vector<8x128xf32>
    %134 = arith.mulf %133, %122 : vector<8x128xf32>
    %135 = arith.addf %132, %134 : vector<8x128xf32>
    %136 = arith.addf %116, %135 : vector<8x128xf32>
    %c0_147 = arith.constant 0 : index
    %c1_148 = arith.constant 1 : index
    %c0_149 = arith.constant 0 : index
    %c2_150 = arith.constant 2 : index
    %c0_151 = arith.constant 0 : index
    %137 = vector.load %arg4[%c0_147, %c1_148, %c0_149, %c2_150, %c0_151] : memref<1x2x2x4x128xf32, #tpu.memory_space<vmem>>, vector<1x1x1x1x128xf32>
    %138 = vector.shape_cast %137 : vector<1x1x1x1x128xf32> to vector<1x128xf32>
    %c0_152 = arith.constant 0 : index
    %c1_153 = arith.constant 1 : index
    %c1_154 = arith.constant 1 : index
    %c2_155 = arith.constant 2 : index
    %c0_156 = arith.constant 0 : index
    %139 = vector.load %arg4[%c0_152, %c1_153, %c1_154, %c2_155, %c0_156] : memref<1x2x2x4x128xf32, #tpu.memory_space<vmem>>, vector<1x1x1x1x128xf32>
    %140 = vector.shape_cast %139 : vector<1x1x1x1x128xf32> to vector<1x128xf32>
    %c0_157 = arith.constant 0 : index
    %c0_158 = arith.constant 0 : index
    %c2_159 = arith.constant 2 : index
    %c0_160 = arith.constant 0 : index
    %c0_161 = arith.constant 0 : index
    %141 = vector.load %arg5[%c0_157, %c0_158, %c2_159, %c0_160, %c0_161] : memref<1x2x4x8x128xf32, #tpu.memory_space<vmem>>, vector<1x1x1x8x128xf32>
    %142 = vector.shape_cast %141 : vector<1x1x1x8x128xf32> to vector<8x128xf32>
    %c0_162 = arith.constant 0 : index
    %c1_163 = arith.constant 1 : index
    %c2_164 = arith.constant 2 : index
    %c0_165 = arith.constant 0 : index
    %c0_166 = arith.constant 0 : index
    %143 = vector.load %arg5[%c0_162, %c1_163, %c2_164, %c0_165, %c0_166] : memref<1x2x4x8x128xf32, #tpu.memory_space<vmem>>, vector<1x1x1x8x128xf32>
    %144 = vector.shape_cast %143 : vector<1x1x1x8x128xf32> to vector<8x128xf32>
    %145 = vector.broadcast %138 : vector<1x128xf32> to vector<8x128xf32>
    %146 = arith.mulf %145, %142 : vector<8x128xf32>
    %147 = vector.broadcast %140 : vector<1x128xf32> to vector<8x128xf32>
    %148 = arith.mulf %147, %144 : vector<8x128xf32>
    %149 = arith.subf %146, %148 : vector<8x128xf32>
    %150 = arith.addf %130, %149 : vector<8x128xf32>
    %151 = vector.broadcast %138 : vector<1x128xf32> to vector<8x128xf32>
    %152 = arith.mulf %151, %144 : vector<8x128xf32>
    %153 = vector.broadcast %140 : vector<1x128xf32> to vector<8x128xf32>
    %154 = arith.mulf %153, %142 : vector<8x128xf32>
    %155 = arith.addf %152, %154 : vector<8x128xf32>
    %156 = arith.addf %136, %155 : vector<8x128xf32>
    %c0_167 = arith.constant 0 : index
    %c1_168 = arith.constant 1 : index
    %c0_169 = arith.constant 0 : index
    %c3_170 = arith.constant 3 : index
    %c0_171 = arith.constant 0 : index
    %157 = vector.load %arg4[%c0_167, %c1_168, %c0_169, %c3_170, %c0_171] : memref<1x2x2x4x128xf32, #tpu.memory_space<vmem>>, vector<1x1x1x1x128xf32>
    %158 = vector.shape_cast %157 : vector<1x1x1x1x128xf32> to vector<1x128xf32>
    %c0_172 = arith.constant 0 : index
    %c1_173 = arith.constant 1 : index
    %c1_174 = arith.constant 1 : index
    %c3_175 = arith.constant 3 : index
    %c0_176 = arith.constant 0 : index
    %159 = vector.load %arg4[%c0_172, %c1_173, %c1_174, %c3_175, %c0_176] : memref<1x2x2x4x128xf32, #tpu.memory_space<vmem>>, vector<1x1x1x1x128xf32>
    %160 = vector.shape_cast %159 : vector<1x1x1x1x128xf32> to vector<1x128xf32>
    %c0_177 = arith.constant 0 : index
    %c0_178 = arith.constant 0 : index
    %c3_179 = arith.constant 3 : index
    %c0_180 = arith.constant 0 : index
    %c0_181 = arith.constant 0 : index
    %161 = vector.load %arg5[%c0_177, %c0_178, %c3_179, %c0_180, %c0_181] : memref<1x2x4x8x128xf32, #tpu.memory_space<vmem>>, vector<1x1x1x8x128xf32>
    %162 = vector.shape_cast %161 : vector<1x1x1x8x128xf32> to vector<8x128xf32>
    %c0_182 = arith.constant 0 : index
    %c1_183 = arith.constant 1 : index
    %c3_184 = arith.constant 3 : index
    %c0_185 = arith.constant 0 : index
    %c0_186 = arith.constant 0 : index
    %163 = vector.load %arg5[%c0_182, %c1_183, %c3_184, %c0_185, %c0_186] : memref<1x2x4x8x128xf32, #tpu.memory_space<vmem>>, vector<1x1x1x8x128xf32>
    %164 = vector.shape_cast %163 : vector<1x1x1x8x128xf32> to vector<8x128xf32>
    %165 = vector.broadcast %158 : vector<1x128xf32> to vector<8x128xf32>
    %166 = arith.mulf %165, %162 : vector<8x128xf32>
    %167 = vector.broadcast %160 : vector<1x128xf32> to vector<8x128xf32>
    %168 = arith.mulf %167, %164 : vector<8x128xf32>
    %169 = arith.subf %166, %168 : vector<8x128xf32>
    %170 = arith.addf %150, %169 : vector<8x128xf32>
    %171 = vector.broadcast %158 : vector<1x128xf32> to vector<8x128xf32>
    %172 = arith.mulf %171, %164 : vector<8x128xf32>
    %173 = vector.broadcast %160 : vector<1x128xf32> to vector<8x128xf32>
    %174 = arith.mulf %173, %162 : vector<8x128xf32>
    %175 = arith.addf %172, %174 : vector<8x128xf32>
    %176 = arith.addf %156, %175 : vector<8x128xf32>
    %c0_187 = arith.constant 0 : index
    %c1_188 = arith.constant 1 : index
    %c0_189 = arith.constant 0 : index
    %c0_190 = arith.constant 0 : index
    %c0_191 = arith.constant 0 : index
    %177 = vector.load %arg6[%c0_187, %c1_188, %c0_189, %c0_190, %c0_191] : memref<1x2x2x8x128xf32, #tpu.memory_space<vmem>>, vector<1x1x1x8x128xf32>
    %178 = vector.shape_cast %177 : vector<1x1x1x8x128xf32> to vector<8x128xf32>
    %179 = vector.shape_cast %170 : vector<8x128xf32> to vector<1x1x1x8x128xf32>
    tpu.vector_store %arg6[%c0_187, %c1_188, %c0_189, %c0_190, %c0_191], %179 {strides = array<i32>} : memref<1x2x2x8x128xf32, #tpu.memory_space<vmem>>, vector<1x1x1x8x128xf32>,
    %c0_192 = arith.constant 0 : index
    %c1_193 = arith.constant 1 : index
    %c1_194 = arith.constant 1 : index
    %c0_195 = arith.constant 0 : index
    %c0_196 = arith.constant 0 : index
    %180 = vector.load %arg6[%c0_192, %c1_193, %c1_194, %c0_195, %c0_196] : memref<1x2x2x8x128xf32, #tpu.memory_space<vmem>>, vector<1x1x1x8x128xf32>
    %181 = vector.shape_cast %180 : vector<1x1x1x8x128xf32> to vector<8x128xf32>
    %182 = vector.shape_cast %176 : vector<8x128xf32> to vector<1x1x1x8x128xf32>
    tpu.vector_store %arg6[%c0_192, %c1_193, %c1_194, %c0_195, %c0_196], %182 {strides = array<i32>} : memref<1x2x2x8x128xf32, #tpu.memory_space<vmem>>, vector<1x1x1x8x128xf32>,
    return
  }
  func.func @transform_0(%arg0: i32, %arg1: i32, %arg2: i32, %arg3: i32) -> (i32, i32, i32, i32, i32) {
    %c0_i32 = arith.constant 0 : i32
    %c0_i32_0 = arith.constant 0 : i32
    %c0_i32_1 = arith.constant 0 : i32
    return %arg0, %c0_i32, %c0_i32_0, %arg3, %arg2 : i32, i32, i32, i32, i32
  }
  func.func @transform_1(%arg0: i32, %arg1: i32, %arg2: i32, %arg3: i32) -> (i32, i32, i32, i32, i32) {
    %c0_i32 = arith.constant 0 : i32
    %c0_i32_0 = arith.constant 0 : i32
    return %arg0, %c0_i32, %arg3, %arg1, %arg2 : i32, i32, i32, i32, i32
  }
  func.func @transform_2(%arg0: i32, %arg1: i32, %arg2: i32, %arg3: i32) -> (i32, i32, i32, i32, i32) {
    %c0_i32 = arith.constant 0 : i32
    %c0_i32_0 = arith.constant 0 : i32
    %c0_i32_1 = arith.constant 0 : i32
    return %arg0, %c0_i32, %c0_i32_0, %arg1, %arg2 : i32, i32, i32, i32, i32
  }
}

</mosaic_0001>

<bundles_post_ra>
// kernel: factorized_spectral_conv4d.1
= control target key start
LH: loop header
LB: loop body
LE: loop exit
PB: predicated region body
PF: predicated region fallthrough
CT: control target
= control target key end

     0   :  { %s709_s9 = smov 0   ;;  %s711_s10 = smov 0   ;;  %s786_s0 = inlined_call_operand.vmem [shape: f32[8,2,2,4,128], index: 0, kind: input, shape index: {}]   ;;  %s787_s1 = inlined_call_operand.vmem [shape: f32[8,2,4,8,128], index: 1, kind: input, shape index: {}]   ;;  %s788_s2 = inlined_call_operand.vmem [shape: f32[8,2,2,8,128], index: 2, kind: output, shape index: {}]  }
   0x1   :  { %s713_s11 = smov 0  }
   0x2 LB: > { %s38_s12 = sadd.s32 1, %s688_s10  ;;  %p585_p0 = scmp.ge.s32.totalorder %s692_s11, 1  ;;  %s692_s11 = sphi %s713_s11, %s12_s11   ;;  %s688_s10 = sphi %s711_s10, %s790_s10   ;;  %s684_s9 = sphi %s709_s9, %s789_s9  }
   0x3   : > { %p40_p1 = scmp.ge.s32.totalorder %s38_s12, 8  ;;  %p179_p2 = scmp.lt.s32.totalorder %s692_s11, 9 }
   0x5   : > { %s792_s12 = smov (%p40_p1, %s38_s12), 0  ;;  %p180_p3 = pnand %p585_p0, %p179_p2 }
   0x6   : > { %p228_p4 = scmp.lt.s32.totalorder (!%p180_p3), %s684_s9, 7 }
   0x7   : > { %183 = sbr.rel (%p180_p3) target bundleno = 40 (0x28), region = 28 }
   0xc   : > { %s794_s9 = smov (!%p228_p4, %s684_s9), 7 }
   0xd   : > { %s642_s13 = sshll.u32 %s794_s9, 4  ;;  %s643_s14 = sshll.u32 %s794_s9, 6 }
   0xe   : > { %s734_s17 = scalar_lea.vmem %s786_s0, %s642_s13  ;;  %s253_s20 = scalar_lea.vmem %s787_s1, %s643_s14 }
   0xf   : > { %v595_v0 = vld [vmem:[%s734_s17] ss:$0 sm:$0xff]  ;;  %v596_v1 = vld [vmem:[%s734_s17 + $0x4] ss:$0 sm:$0xff]  ;;  %v600_v5 = vld [vmem:[%s734_s17 + $0x1] ss:$0 sm:$0xff] }
  0x10   : > { %v741_v2 = vld [vmem:[%s253_s20] sm:$0xff]  ;;  %v750_v9 = vld [vmem:[%s253_s20 + $0x8] sm:$0xff]  ;;  %v603_v16 = vld [vmem:[%s253_s20 + $0x10] sm:$0xff]  ;;  %s644_s21 = sshll.u32 %s794_s9, 5 }
  0x11   : > { %v743_v3 = vld [vmem:[%s253_s20 + $0x20] sm:$0xff]  ;;  %v287_v4 = vmul.f32 %v595_v0, %v741_v2  ;;  %v296_v7 = vmul.f32 %v596_v1, %v741_v2  ;;  %v599_v10 = vld [vmem:[%s253_s20 + $0x28] sm:$0xff]  ;;  %v309_v13 = vmul.f32 %v600_v5, %v750_v9  ;;  %v604_v17 = vld [vmem:[%s253_s20 + $0x30] sm:$0xff]  ;;  %s265_s24 = scalar_lea.vmem %s788_s2, %s644_s21 }
  0x12   : > { %v601_v6 = vld [vmem:[%s734_s17 + $0x5] ss:$0 sm:$0xff]  ;;  %v292_v8 = vmul.f32 %v596_v1, %v743_v3  ;;  %v605_v11 = vld [vmem:[%s734_s17 + $0x2] ss:$0 sm:$0xff]  ;;  %v295_v12 = vmul.f32 %v595_v0, %v743_v3  ;;  %v606_v15 = vld [vmem:[%s734_s17 + $0x6] ss:$0 sm:$0xff]  ;;  %v317_v18 = vmul.f32 %v600_v5, %v599_v10 }
  0x13   : > { %v314_v14 = vmul.f32 %v601_v6, %v599_v10  ;;  %v318_v19 = vmul.f32 %v601_v6, %v750_v9  ;;  %v331_v21 = vmul.f32 %v605_v11, %v603_v16  ;;  %v336_v22 = vmul.f32 %v606_v15, %v604_v17  ;;  %v610_v23 = vld [vmem:[%s734_s17 + $0x3] ss:$0 sm:$0xff]  ;;  %v611_v24 = vld [vmem:[%s734_s17 + $0x7] ss:$0 sm:$0xff]  ;;  %v608_v25 = vld [vmem:[%s253_s20 + $0x18] sm:$0xff] }
  0x14   : > { %v293_v20 = vsub.f32 %v287_v4, %v292_v8  ;;  %v297_v26 = vadd.f32 %v296_v7, %v295_v12  ;;  %v609_v28 = vld [vmem:[%s253_s20 + $0x38] sm:$0xff]  ;;  %v353_v29 = vmul.f32 %v610_v23, %v608_v25  ;;  %v339_v31 = vmul.f32 %v605_v11, %v604_v17  ;;  %v618_v32 = vld [vmem:[%s734_s17 + $0x8] ss:$0 sm:$0xff]  ;;  %v619_v33 = vld [vmem:[%s734_s17 + $0xc] ss:$0 sm:$0xff] }
  0x15   : > { %v315_v27 = vsub.f32 %v309_v13, %v314_v14  ;;  %v319_v30 = vadd.f32 %v318_v19, %v317_v18  ;;  %v337_v34 = vsub.f32 %v331_v21, %v336_v22  ;;  %v358_v35 = vmul.f32 %v611_v24, %v609_v28  ;;  %v624_v36 = vld [vmem:[%s734_s17 + $0x9] ss:$0 sm:$0xff]  ;;  %v625_v37 = vld [vmem:[%s734_s17 + $0xd] ss:$0 sm:$0xff]  ;;  %v630_v42 = vld [vmem:[%s734_s17 + $0xa] ss:$0 sm:$0xff] }
  0x16   : > { %v340_v38 = vmul.f32 %v606_v15, %v603_v16  ;;  %v361_v39 = vmul.f32 %v610_v23, %v609_v28  ;;  %v362_v40 = vmul.f32 %v611_v24, %v608_v25  ;;  %v381_v41 = vmul.f32 %v618_v32, %v741_v2  ;;  %v631_v43 = vld [vmem:[%s734_s17 + $0xe] ss:$0 sm:$0xff]  ;;  %v636_v48 = vld [vmem:[%s734_s17 + $0xb] ss:$0 sm:$0xff]  ;;  %v637_v49 = vld [vmem:[%s734_s17 + $0xf] ss:$0 sm:$0xff] }
  0x17   : > { %v316_v44 = vadd.f32 %v315_v27, %v293_v20  ;;  %v359_v45 = vsub.f32 %v353_v29, %v358_v35  ;;  %v320_v46 = vadd.f32 %v319_v30, %v297_v26  ;;  %v386_v47 = vmul.f32 %v619_v33, %v743_v3 }
  0x18   : > { %v341_v50 = vadd.f32 %v340_v38, %v339_v31  ;;  %v363_v51 = vadd.f32 %v362_v40, %v361_v39  ;;  %v401_v52 = vmul.f32 %v624_v36, %v750_v9  ;;  %v406_v53 = vmul.f32 %v625_v37, %v599_v10 }
  0x19   : > { %v338_v54 = vadd.f32 %v337_v34, %v316_v44  ;;  %v387_v55 = vsub.f32 %v381_v41, %v386_v47  ;;  %v421_v56 = vmul.f32 %v630_v42, %v603_v16  ;;  %v426_v57 = vmul.f32 %v631_v43, %v604_v17 }
  0x1a   : > { %v342_v58 = vadd.f32 %v341_v50, %v320_v46  ;;  %v407_v59 = vsub.f32 %v401_v52, %v406_v53  ;;  %v441_v60 = vmul.f32 %v636_v48, %v608_v25  ;;  %v446_v61 = vmul.f32 %v637_v49, %v609_v28 }
  0x1b   : > { %v360_v62 = vadd.f32 %v359_v45, %v338_v54  ;;  %v427_v63 = vsub.f32 %v421_v56, %v426_v57  ;;  %v389_v0 = vmul.f32 %v618_v32, %v743_v3  ;;  %v390_v5 = vmul.f32 %v619_v33, %v741_v2 }
  0x1c   : > { %v364_v1 = vadd.f32 %v363_v51, %v342_v58  ;;  %v447_v4 = vsub.f32 %v441_v60, %v446_v61  ;;  %v409_v6 = vmul.f32 %v624_v36, %v599_v10  ;;  %v408_v7 = vadd.f32 %v407_v59, %v387_v55 }
  0x1d   : > { %365 = vst [vmem:[%s265_s24] sm:$0xff] %v360_v62  ;;  %v410_v8 = vmul.f32 %v625_v37, %v750_v9  ;;  %v429_v11 = vmul.f32 %v630_v42, %v604_v17  ;;  %v430_v12 = vmul.f32 %v631_v43, %v603_v16  ;;  %v391_v13 = vadd.f32 %v390_v5, %v389_v0 }
  0x1e   : > { %612 = vst [vmem:[%s265_s24 + $0x8] sm:$0xff] %v364_v1  ;;  %v449_v14 = vmul.f32 %v636_v48, %v609_v28  ;;  %v450_v15 = vmul.f32 %v637_v49, %v608_v25  ;;  %v428_v18 = vadd.f32 %v427_v63, %v408_v7 }
  0x1f   : > { %v411_v19 = vadd.f32 %v410_v8, %v409_v6  ;;  %v431_v20 = vadd.f32 %v430_v12, %v429_v11 }
  0x20   : > { %v448_v21 = vadd.f32 %v447_v4, %v428_v18  ;;  %v451_v22 = vadd.f32 %v450_v15, %v449_v14 }
  0x21   : > { %v412_v3 = vadd.f32 %v411_v19, %v391_v13 }
  0x22   : > { %638 = vst [vmem:[%s265_s24 + $0x10] sm:$0xff] %v448_v21 }
  0x23   : > { %v432_v23 = vadd.f32 %v431_v20, %v412_v3 }
  0x25   : > { %v452_v2 = vadd.f32 %v451_v22, %v432_v23 }
  0x27   : > { %639 = vst [vmem:[%s265_s24 + $0x18] sm:$0xff] %v452_v2 }
  0x28 PF: > { %s12_s11 = sadd.s32 1, %s692_s11   ;;  %s789_s9 = smov %s688_s10 }
  0x29   : > { %p9_p5 = scmp.ge.s32.totalorder %s12_s11, 10   ;;  %s790_s10 = smov %s792_s12 }
  0x2b   :  { %11 = sbr.rel (!%p9_p5) target bundleno = 2 (0x2), region = 78 }

// kernel: reverse.1
= control target key start
LH: loop header
LB: loop body
LE: loop exit
PB: predicated region body
PF: predicated region fallthrough
CT: control target
= control target key end

     0   :  { %s2312_s0 = inlined_call_operand.vmem [shape: f32[2,4,8,8,8,3], index: 0, kind: input, shape index: {}]   ;;  %s2313_s1 = inlined_call_operand.vmem [shape: f32[2,4,8,8,8,3], index: 1, kind: output, shape index: {}]  }
   0x1   :  { %v768_v0 = vld [vmem:[%s2312_s0 + $0x80] sm:$0xff]  ;;  %v814_v24 = vld [vmem:[%s2312_s0 + $0x88] sm:$0xff]  ;;  %v862_v48 = vld [vmem:[%s2312_s0 + $0x90] sm:$0xff] }
   0x2   :  { %v769_v1 = vld [vmem:[%s2312_s0 + $0x380] sm:$0xff]  ;;  %4 = vst [vmem:[%s2313_s1] sm:$0xff] %v768_v0  ;;  %v816_v25 = vld [vmem:[%s2312_s0 + $0x388] sm:$0xff]  ;;  %815 = vst [vmem:[%s2313_s1 + $0x8] sm:$0xff] %v814_v24 }
   0x3   :  { %v771_v2 = vld [vmem:[%s2312_s0 + $0x140] sm:$0xff]  ;;  %770 = vst [vmem:[%s2313_s1 + $0x300] sm:$0xff] %v769_v1  ;;  %v818_v26 = vld [vmem:[%s2312_s0 + $0x148] sm:$0xff]  ;;  %817 = vst [vmem:[%s2313_s1 + $0x308] sm:$0xff] %v816_v25 }
   0x4   :  { %772 = vst [vmem:[%s2313_s1 + $0xc0] sm:$0xff] %v771_v2  ;;  %v773_v3 = vld [vmem:[%s2312_s0 + $0x440] sm:$0xff]  ;;  %819 = vst [vmem:[%s2313_s1 + $0xc8] sm:$0xff] %v818_v26  ;;  %v820_v27 = vld [vmem:[%s2312_s0 + $0x448] sm:$0xff] }
   0x5   :  { %v775_v4 = vld [vmem:[%s2312_s0 + $0x200] sm:$0xff]  ;;  %774 = vst [vmem:[%s2313_s1 + $0x3c0] sm:$0xff] %v773_v3  ;;  %v822_v28 = vld [vmem:[%s2312_s0 + $0x208] sm:$0xff]  ;;  %821 = vst [vmem:[%s2313_s1 + $0x3c8] sm:$0xff] %v820_v27 }
   0x6   :  { %v777_v5 = vld [vmem:[%s2312_s0 + $0x500] sm:$0xff]  ;;  %776 = vst [vmem:[%s2313_s1 + $0x180] sm:$0xff] %v775_v4  ;;  %v824_v29 = vld [vmem:[%s2312_s0 + $0x508] sm:$0xff]  ;;  %823 = vst [vmem:[%s2313_s1 + $0x188] sm:$0xff] %v822_v28 }
   0x7   :  { %778 = vst [vmem:[%s2313_s1 + $0x480] sm:$0xff] %v777_v5  ;;  %v779_v6 = vld [vmem:[%s2312_s0 + $0x2c0] sm:$0xff]  ;;  %825 = vst [vmem:[%s2313_s1 + $0x488] sm:$0xff] %v824_v29  ;;  %v826_v30 = vld [vmem:[%s2312_s0 + $0x2c8] sm:$0xff] }
   0x8   :  { %v781_v7 = vld [vmem:[%s2312_s0 + $0x5c0] sm:$0xff]  ;;  %780 = vst [vmem:[%s2313_s1 + $0x240] sm:$0xff] %v779_v6  ;;  %v828_v31 = vld [vmem:[%s2312_s0 + $0x5c8] sm:$0xff]  ;;  %827 = vst [vmem:[%s2313_s1 + $0x248] sm:$0xff] %v826_v30 }
   0x9   :  { %v783_v8 = vld [vmem:[%s2312_s0 + $0x40] sm:$0xff]  ;;  %782 = vst [vmem:[%s2313_s1 + $0x540] sm:$0xff] %v781_v7  ;;  %v830_v32 = vld [vmem:[%s2312_s0 + $0x48] sm:$0xff]  ;;  %829 = vst [vmem:[%s2313_s1 + $0x548] sm:$0xff] %v828_v31 }
   0xa   :  { %784 = vst [vmem:[%s2313_s1 + $0x40] sm:$0xff] %v783_v8  ;;  %v785_v9 = vld [vmem:[%s2312_s0 + $0x340] sm:$0xff]  ;;  %831 = vst [vmem:[%s2313_s1 + $0x48] sm:$0xff] %v830_v32  ;;  %v832_v33 = vld [vmem:[%s2312_s0 + $0x348] sm:$0xff] }
   0xb   :  { %v787_v10 = vld [vmem:[%s2312_s0 + $0x100] sm:$0xff]  ;;  %786 = vst [vmem:[%s2313_s1 + $0x340] sm:$0xff] %v785_v9  ;;  %v834_v34 = vld [vmem:[%s2312_s0 + $0x108] sm:$0xff]  ;;  %833 = vst [vmem:[%s2313_s1 + $0x348] sm:$0xff] %v832_v33 }
   0xc   :  { %v789_v11 = vld [vmem:[%s2312_s0 + $0x400] sm:$0xff]  ;;  %788 = vst [vmem:[%s2313_s1 + $0x100] sm:$0xff] %v787_v10  ;;  %v836_v35 = vld [vmem:[%s2312_s0 + $0x408] sm:$0xff]  ;;  %835 = vst [vmem:[%s2313_s1 + $0x108] sm:$0xff] %v834_v34 }
   0xd   :  { %790 = vst [vmem:[%s2313_s1 + $0x400] sm:$0xff] %v789_v11  ;;  %v791_v12 = vld [vmem:[%s2312_s0 + $0x1c0] sm:$0xff]  ;;  %837 = vst [vmem:[%s2313_s1 + $0x408] sm:$0xff] %v836_v35  ;;  %v838_v36 = vld [vmem:[%s2312_s0 + $0x1c8] sm:$0xff] }
   0xe   :  { %v793_v13 = vld [vmem:[%s2312_s0 + $0x4c0] sm:$0xff]  ;;  %792 = vst [vmem:[%s2313_s1 + $0x1c0] sm:$0xff] %v791_v12  ;;  %v840_v37 = vld [vmem:[%s2312_s0 + $0x4c8] sm:$0xff]  ;;  %839 = vst [vmem:[%s2313_s1 + $0x1c8] sm:$0xff] %v838_v36 }
   0xf   :  { %v795_v14 = vld [vmem:[%s2312_s0 + $0x280] sm:$0xff]  ;;  %794 = vst [vmem:[%s2313_s1 + $0x4c0] sm:$0xff] %v793_v13  ;;  %v842_v38 = vld [vmem:[%s2312_s0 + $0x288] sm:$0xff]  ;;  %841 = vst [vmem:[%s2313_s1 + $0x4c8] sm:$0xff] %v840_v37 }
  0x10   :  { %796 = vst [vmem:[%s2313_s1 + $0x280] sm:$0xff] %v795_v14  ;;  %v797_v15 = vld [vmem:[%s2312_s0 + $0x580] sm:$0xff]  ;;  %843 = vst [vmem:[%s2313_s1 + $0x288] sm:$0xff] %v842_v38  ;;  %v844_v39 = vld [vmem:[%s2312_s0 + $0x588] sm:$0xff] }
  0x11   :  { %v65_v16 = vld [vmem:[%s2312_s0] sm:$0xff]  ;;  %798 = vst [vmem:[%s2313_s1 + $0x580] sm:$0xff] %v797_v15  ;;  %v846_v40 = vld [vmem:[%s2312_s0 + $0x8] sm:$0xff]  ;;  %845 = vst [vmem:[%s2313_s1 + $0x588] sm:$0xff] %v844_v39 }
  0x12   :  { %v800_v17 = vld [vmem:[%s2312_s0 + $0x300] sm:$0xff]  ;;  %799 = vst [vmem:[%s2313_s1 + $0x80] sm:$0xff] %v65_v16  ;;  %v848_v41 = vld [vmem:[%s2312_s0 + $0x308] sm:$0xff]  ;;  %847 = vst [vmem:[%s2313_s1 + $0x88] sm:$0xff] %v846_v40 }
  0x13   :  { %801 = vst [vmem:[%s2313_s1 + $0x380] sm:$0xff] %v800_v17  ;;  %v802_v18 = vld [vmem:[%s2312_s0 + $0xc0] sm:$0xff]  ;;  %849 = vst [vmem:[%s2313_s1 + $0x388] sm:$0xff] %v848_v41  ;;  %v850_v42 = vld [vmem:[%s2312_s0 + $0xc8] sm:$0xff] }
  0x14   :  { %v804_v19 = vld [vmem:[%s2312_s0 + $0x3c0] sm:$0xff]  ;;  %803 = vst [vmem:[%s2313_s1 + $0x140] sm:$0xff] %v802_v18  ;;  %v852_v43 = vld [vmem:[%s2312_s0 + $0x3c8] sm:$0xff]  ;;  %851 = vst [vmem:[%s2313_s1 + $0x148] sm:$0xff] %v850_v42 }
  0x15   :  { %v806_v20 = vld [vmem:[%s2312_s0 + $0x180] sm:$0xff]  ;;  %805 = vst [vmem:[%s2313_s1 + $0x440] sm:$0xff] %v804_v19  ;;  %v854_v44 = vld [vmem:[%s2312_s0 + $0x188] sm:$0xff]  ;;  %853 = vst [vmem:[%s2313_s1 + $0x448] sm:$0xff] %v852_v43 }
  0x16   :  { %807 = vst [vmem:[%s2313_s1 + $0x200] sm:$0xff] %v806_v20  ;;  %v808_v21 = vld [vmem:[%s2312_s0 + $0x480] sm:$0xff]  ;;  %855 = vst [vmem:[%s2313_s1 + $0x208] sm:$0xff] %v854_v44  ;;  %v856_v45 = vld [vmem:[%s2312_s0 + $0x488] sm:$0xff] }
  0x17   :  { %v810_v22 = vld [vmem:[%s2312_s0 + $0x240] sm:$0xff]  ;;  %809 = vst [vmem:[%s2313_s1 + $0x500] sm:$0xff] %v808_v21  ;;  %v858_v46 = vld [vmem:[%s2312_s0 + $0x248] sm:$0xff]  ;;  %857 = vst [vmem:[%s2313_s1 + $0x508] sm:$0xff] %v856_v45 }
  0x18   :  { %v812_v23 = vld [vmem:[%s2312_s0 + $0x540] sm:$0xff]  ;;  %811 = vst [vmem:[%s2313_s1 + $0x2c0] sm:$0xff] %v810_v22  ;;  %v860_v47 = vld [vmem:[%s2312_s0 + $0x548] sm:$0xff]  ;;  %859 = vst [vmem:[%s2313_s1 + $0x2c8] sm:$0xff] %v858_v46 }
  0x19   :  { %813 = vst [vmem:[%s2313_s1 + $0x5c0] sm:$0xff] %v812_v23  ;;  %861 = vst [vmem:[%s2313_s1 + $0x5c8] sm:$0xff] %v860_v47  ;;  %v864_v49 = vld [vmem:[%s2312_s0 + $0x390] sm:$0xff]  ;;  %v910_v8 = vld [vmem:[%s2312_s0 + $0x98] sm:$0xff] }
  0x1a   :  { %v866_v50 = vld [vmem:[%s2312_s0 + $0x150] sm:$0xff]  ;;  %863 = vst [vmem:[%s2313_s1 + $0x10] sm:$0xff] %v862_v48  ;;  %865 = vst [vmem:[%s2313_s1 + $0x310] sm:$0xff] %v864_v49  ;;  %v912_v9 = vld [vmem:[%s2312_s0 + $0x398] sm:$0xff] }
  0x1b   :  { %867 = vst [vmem:[%s2313_s1 + $0xd0] sm:$0xff] %v866_v50  ;;  %v868_v51 = vld [vmem:[%s2312_s0 + $0x450] sm:$0xff]  ;;  %v914_v10 = vld [vmem:[%s2312_s0 + $0x158] sm:$0xff]  ;;  %911 = vst [vmem:[%s2313_s1 + $0x18] sm:$0xff] %v910_v8 }
  0x1c   :  { %v870_v52 = vld [vmem:[%s2312_s0 + $0x210] sm:$0xff]  ;;  %869 = vst [vmem:[%s2313_s1 + $0x3d0] sm:$0xff] %v868_v51  ;;  %913 = vst [vmem:[%s2313_s1 + $0x318] sm:$0xff] %v912_v9  ;;  %v916_v11 = vld [vmem:[%s2312_s0 + $0x458] sm:$0xff] }
  0x1d   :  { %v872_v53 = vld [vmem:[%s2312_s0 + $0x510] sm:$0xff]  ;;  %871 = vst [vmem:[%s2313_s1 + $0x190] sm:$0xff] %v870_v52  ;;  %915 = vst [vmem:[%s2313_s1 + $0xd8] sm:$0xff] %v914_v10  ;;  %v918_v12 = vld [vmem:[%s2312_s0 + $0x218] sm:$0xff] }
  0x1e   :  { %873 = vst [vmem:[%s2313_s1 + $0x490] sm:$0xff] %v872_v53  ;;  %v874_v54 = vld [vmem:[%s2312_s0 + $0x2d0] sm:$0xff]  ;;  %v920_v13 = vld [vmem:[%s2312_s0 + $0x518] sm:$0xff]  ;;  %917 = vst [vmem:[%s2313_s1 + $0x3d8] sm:$0xff] %v916_v11 }
  0x1f   :  { %v876_v55 = vld [vmem:[%s2312_s0 + $0x5d0] sm:$0xff]  ;;  %875 = vst [vmem:[%s2313_s1 + $0x250] sm:$0xff] %v874_v54  ;;  %919 = vst [vmem:[%s2313_s1 + $0x198] sm:$0xff] %v918_v12  ;;  %v922_v14 = vld [vmem:[%s2312_s0 + $0x2d8] sm:$0xff] }
  0x20   :  { %v878_v56 = vld [vmem:[%s2312_s0 + $0x50] sm:$0xff]  ;;  %877 = vst [vmem:[%s2313_s1 + $0x550] sm:$0xff] %v876_v55  ;;  %921 = vst [vmem:[%s2313_s1 + $0x498] sm:$0xff] %v920_v13  ;;  %v924_v15 = vld [vmem:[%s2312_s0 + $0x5d8] sm:$0xff] }
  0x21   :  { %879 = vst [vmem:[%s2313_s1 + $0x50] sm:$0xff] %v878_v56  ;;  %v880_v57 = vld [vmem:[%s2312_s0 + $0x350] sm:$0xff]  ;;  %v926_v16 = vld [vmem:[%s2312_s0 + $0x58] sm:$0xff]  ;;  %923 = vst [vmem:[%s2313_s1 + $0x258] sm:$0xff] %v922_v14 }
  0x22   :  { %v882_v58 = vld [vmem:[%s2312_s0 + $0x110] sm:$0xff]  ;;  %881 = vst [vmem:[%s2313_s1 + $0x350] sm:$0xff] %v880_v57  ;;  %925 = vst [vmem:[%s2313_s1 + $0x558] sm:$0xff] %v924_v15  ;;  %v928_v17 = vld [vmem:[%s2312_s0 + $0x358] sm:$0xff] }
  0x23   :  { %v884_v59 = vld [vmem:[%s2312_s0 + $0x410] sm:$0xff]  ;;  %883 = vst [vmem:[%s2313_s1 + $0x110] sm:$0xff] %v882_v58  ;;  %927 = vst [vmem:[%s2313_s1 + $0x58] sm:$0xff] %v926_v16  ;;  %v930_v18 = vld [vmem:[%s2312_s0 + $0x118] sm:$0xff] }
  0x24   :  { %885 = vst [vmem:[%s2313_s1 + $0x410] sm:$0xff] %v884_v59  ;;  %v886_v60 = vld [vmem:[%s2312_s0 + $0x1d0] sm:$0xff]  ;;  %v932_v19 = vld [vmem:[%s2312_s0 + $0x418] sm:$0xff]  ;;  %929 = vst [vmem:[%s2313_s1 + $0x358] sm:$0xff] %v928_v17 }
  0x25   :  { %v888_v61 = vld [vmem:[%s2312_s0 + $0x4d0] sm:$0xff]  ;;  %887 = vst [vmem:[%s2313_s1 + $0x1d0] sm:$0xff] %v886_v60  ;;  %931 = vst [vmem:[%s2313_s1 + $0x118] sm:$0xff] %v930_v18  ;;  %v934_v20 = vld [vmem:[%s2312_s0 + $0x1d8] sm:$0xff] }
  0x26   :  { %v890_v62 = vld [vmem:[%s2312_s0 + $0x290] sm:$0xff]  ;;  %889 = vst [vmem:[%s2313_s1 + $0x4d0] sm:$0xff] %v888_v61  ;;  %933 = vst [vmem:[%s2313_s1 + $0x418] sm:$0xff] %v932_v19  ;;  %v936_v21 = vld [vmem:[%s2312_s0 + $0x4d8] sm:$0xff] }
  0x27   :  { %891 = vst [vmem:[%s2313_s1 + $0x290] sm:$0xff] %v890_v62  ;;  %v892_v63 = vld [vmem:[%s2312_s0 + $0x590] sm:$0xff]  ;;  %v938_v22 = vld [vmem:[%s2312_s0 + $0x298] sm:$0xff]  ;;  %935 = vst [vmem:[%s2313_s1 + $0x1d8] sm:$0xff] %v934_v20 }
  0x28   :  { %v894_v0 = vld [vmem:[%s2312_s0 + $0x10] sm:$0xff]  ;;  %893 = vst [vmem:[%s2313_s1 + $0x590] sm:$0xff] %v892_v63  ;;  %937 = vst [vmem:[%s2313_s1 + $0x4d8] sm:$0xff] %v936_v21  ;;  %v940_v23 = vld [vmem:[%s2312_s0 + $0x598] sm:$0xff] }
  0x29   :  { %v896_v1 = vld [vmem:[%s2312_s0 + $0x310] sm:$0xff]  ;;  %895 = vst [vmem:[%s2313_s1 + $0x90] sm:$0xff] %v894_v0  ;;  %939 = vst [vmem:[%s2313_s1 + $0x298] sm:$0xff] %v938_v22  ;;  %v942_v24 = vld [vmem:[%s2312_s0 + $0x18] sm:$0xff] }
  0x2a   :  { %897 = vst [vmem:[%s2313_s1 + $0x390] sm:$0xff] %v896_v1  ;;  %v898_v2 = vld [vmem:[%s2312_s0 + $0xd0] sm:$0xff]  ;;  %v944_v25 = vld [vmem:[%s2312_s0 + $0x318] sm:$0xff]  ;;  %941 = vst [vmem:[%s2313_s1 + $0x598] sm:$0xff] %v940_v23 }
  0x2b   :  { %v900_v3 = vld [vmem:[%s2312_s0 + $0x3d0] sm:$0xff]  ;;  %899 = vst [vmem:[%s2313_s1 + $0x150] sm:$0xff] %v898_v2  ;;  %943 = vst [vmem:[%s2313_s1 + $0x98] sm:$0xff] %v942_v24  ;;  %v946_v26 = vld [vmem:[%s2312_s0 + $0xd8] sm:$0xff] }
  0x2c   :  { %v902_v4 = vld [vmem:[%s2312_s0 + $0x190] sm:$0xff]  ;;  %901 = vst [vmem:[%s2313_s1 + $0x450] sm:$0xff] %v900_v3  ;;  %945 = vst [vmem:[%s2313_s1 + $0x398] sm:$0xff] %v944_v25  ;;  %v948_v27 = vld [vmem:[%s2312_s0 + $0x3d8] sm:$0xff] }
  0x2d   :  { %903 = vst [vmem:[%s2313_s1 + $0x210] sm:$0xff] %v902_v4  ;;  %v904_v5 = vld [vmem:[%s2312_s0 + $0x490] sm:$0xff]  ;;  %v950_v28 = vld [vmem:[%s2312_s0 + $0x198] sm:$0xff]  ;;  %947 = vst [vmem:[%s2313_s1 + $0x158] sm:$0xff] %v946_v26 }
  0x2e   :  { %v906_v6 = vld [vmem:[%s2312_s0 + $0x250] sm:$0xff]  ;;  %905 = vst [vmem:[%s2313_s1 + $0x510] sm:$0xff] %v904_v5  ;;  %949 = vst [vmem:[%s2313_s1 + $0x458] sm:$0xff] %v948_v27  ;;  %v952_v29 = vld [vmem:[%s2312_s0 + $0x498] sm:$0xff] }
  0x2f   :  { %v908_v7 = vld [vmem:[%s2312_s0 + $0x550] sm:$0xff]  ;;  %907 = vst [vmem:[%s2313_s1 + $0x2d0] sm:$0xff] %v906_v6  ;;  %951 = vst [vmem:[%s2313_s1 + $0x218] sm:$0xff] %v950_v28  ;;  %v954_v30 = vld [vmem:[%s2312_s0 + $0x258] sm:$0xff] }
  0x30   :  { %909 = vst [vmem:[%s2313_s1 + $0x5d0] sm:$0xff] %v908_v7  ;;  %v956_v31 = vld [vmem:[%s2312_s0 + $0x558] sm:$0xff]  ;;  %953 = vst [vmem:[%s2313_s1 + $0x518] sm:$0xff] %v952_v29  ;;  %v958_v32 = vld [vmem:[%s2312_s0 + $0xa0] sm:$0xff] }
  0x31   :  { %955 = vst [vmem:[%s2313_s1 + $0x2d8] sm:$0xff] %v954_v30  ;;  %957 = vst [vmem:[%s2313_s1 + $0x5d8] sm:$0xff] %v956_v31  ;;  %v960_v33 = vld [vmem:[%s2312_s0 + $0x3a0] sm:$0xff]  ;;  %v1006_v56 = vld [vmem:[%s2312_s0 + $0xa8] sm:$0xff] }
  0x32   :  { %v962_v34 = vld [vmem:[%s2312_s0 + $0x160] sm:$0xff]  ;;  %959 = vst [vmem:[%s2313_s1 + $0x20] sm:$0xff] %v958_v32  ;;  %961 = vst [vmem:[%s2313_s1 + $0x320] sm:$0xff] %v960_v33  ;;  %v1008_v57 = vld [vmem:[%s2312_s0 + $0x3a8] sm:$0xff] }
  0x33   :  { %963 = vst [vmem:[%s2313_s1 + $0xe0] sm:$0xff] %v962_v34  ;;  %v964_v35 = vld [vmem:[%s2312_s0 + $0x460] sm:$0xff]  ;;  %v1010_v58 = vld [vmem:[%s2312_s0 + $0x168] sm:$0xff]  ;;  %1007 = vst [vmem:[%s2313_s1 + $0x28] sm:$0xff] %v1006_v56 }
  0x34   :  { %v966_v36 = vld [vmem:[%s2312_s0 + $0x220] sm:$0xff]  ;;  %965 = vst [vmem:[%s2313_s1 + $0x3e0] sm:$0xff] %v964_v35  ;;  %1009 = vst [vmem:[%s2313_s1 + $0x328] sm:$0xff] %v1008_v57  ;;  %v1012_v59 = vld [vmem:[%s2312_s0 + $0x468] sm:$0xff] }
  0x35   :  { %v968_v37 = vld [vmem:[%s2312_s0 + $0x520] sm:$0xff]  ;;  %967 = vst [vmem:[%s2313_s1 + $0x1a0] sm:$0xff] %v966_v36  ;;  %1011 = vst [vmem:[%s2313_s1 + $0xe8] sm:$0xff] %v1010_v58  ;;  %v1014_v60 = vld [vmem:[%s2312_s0 + $0x228] sm:$0xff] }
  0x36   :  { %969 = vst [vmem:[%s2313_s1 + $0x4a0] sm:$0xff] %v968_v37  ;;  %v970_v38 = vld [vmem:[%s2312_s0 + $0x2e0] sm:$0xff]  ;;  %v1016_v61 = vld [vmem:[%s2312_s0 + $0x528] sm:$0xff]  ;;  %1013 = vst [vmem:[%s2313_s1 + $0x3e8] sm:$0xff] %v1012_v59 }
  0x37   :  { %v972_v39 = vld [vmem:[%s2312_s0 + $0x5e0] sm:$0xff]  ;;  %971 = vst [vmem:[%s2313_s1 + $0x260] sm:$0xff] %v970_v38  ;;  %1015 = vst [vmem:[%s2313_s1 + $0x1a8] sm:$0xff] %v1014_v60  ;;  %v1018_v62 = vld [vmem:[%s2312_s0 + $0x2e8] sm:$0xff] }
  0x38   :  { %v974_v40 = vld [vmem:[%s2312_s0 + $0x60] sm:$0xff]  ;;  %973 = vst [vmem:[%s2313_s1 + $0x560] sm:$0xff] %v972_v39  ;;  %1017 = vst [vmem:[%s2313_s1 + $0x4a8] sm:$0xff] %v1016_v61  ;;  %v1020_v63 = vld [vmem:[%s2312_s0 + $0x5e8] sm:$0xff] }
  0x39   :  { %975 = vst [vmem:[%s2313_s1 + $0x60] sm:$0xff] %v974_v40  ;;  %v976_v41 = vld [vmem:[%s2312_s0 + $0x360] sm:$0xff]  ;;  %v1022_v0 = vld [vmem:[%s2312_s0 + $0x68] sm:$0xff]  ;;  %1019 = vst [vmem:[%s2313_s1 + $0x268] sm:$0xff] %v1018_v62 }
  0x3a   :  { %v978_v42 = vld [vmem:[%s2312_s0 + $0x120] sm:$0xff]  ;;  %977 = vst [vmem:[%s2313_s1 + $0x360] sm:$0xff] %v976_v41  ;;  %1021 = vst [vmem:[%s2313_s1 + $0x568] sm:$0xff] %v1020_v63  ;;  %v1024_v1 = vld [vmem:[%s2312_s0 + $0x368] sm:$0xff] }
  0x3b   :  { %v980_v43 = vld [vmem:[%s2312_s0 + $0x420] sm:$0xff]  ;;  %979 = vst [vmem:[%s2313_s1 + $0x120] sm:$0xff] %v978_v42  ;;  %1023 = vst [vmem:[%s2313_s1 + $0x68] sm:$0xff] %v1022_v0  ;;  %v1026_v2 = vld [vmem:[%s2312_s0 + $0x128] sm:$0xff] }
  0x3c   :  { %981 = vst [vmem:[%s2313_s1 + $0x420] sm:$0xff] %v980_v43  ;;  %v982_v44 = vld [vmem:[%s2312_s0 + $0x1e0] sm:$0xff]  ;;  %v1028_v3 = vld [vmem:[%s2312_s0 + $0x428] sm:$0xff]  ;;  %1025 = vst [vmem:[%s2313_s1 + $0x368] sm:$0xff] %v1024_v1 }
  0x3d   :  { %v984_v45 = vld [vmem:[%s2312_s0 + $0x4e0] sm:$0xff]  ;;  %983 = vst [vmem:[%s2313_s1 + $0x1e0] sm:$0xff] %v982_v44  ;;  %1027 = vst [vmem:[%s2313_s1 + $0x128] sm:$0xff] %v1026_v2  ;;  %v1030_v4 = vld [vmem:[%s2312_s0 + $0x1e8] sm:$0xff] }
  0x3e   :  { %v986_v46 = vld [vmem:[%s2312_s0 + $0x2a0] sm:$0xff]  ;;  %985 = vst [vmem:[%s2313_s1 + $0x4e0] sm:$0xff] %v984_v45  ;;  %1029 = vst [vmem:[%s2313_s1 + $0x428] sm:$0xff] %v1028_v3  ;;  %v1032_v5 = vld [vmem:[%s2312_s0 + $0x4e8] sm:$0xff] }
  0x3f   :  { %987 = vst [vmem:[%s2313_s1 + $0x2a0] sm:$0xff] %v986_v46  ;;  %v988_v47 = vld [vmem:[%s2312_s0 + $0x5a0] sm:$0xff]  ;;  %v1034_v6 = vld [vmem:[%s2312_s0 + $0x2a8] sm:$0xff]  ;;  %1031 = vst [vmem:[%s2313_s1 + $0x1e8] sm:$0xff] %v1030_v4 }
  0x40   :  { %v990_v48 = vld [vmem:[%s2312_s0 + $0x20] sm:$0xff]  ;;  %989 = vst [vmem:[%s2313_s1 + $0x5a0] sm:$0xff] %v988_v47  ;;  %1033 = vst [vmem:[%s2313_s1 + $0x4e8] sm:$0xff] %v1032_v5  ;;  %v1036_v7 = vld [vmem:[%s2312_s0 + $0x5a8] sm:$0xff] }
  0x41   :  { %v992_v49 = vld [vmem:[%s2312_s0 + $0x320] sm:$0xff]  ;;  %991 = vst [vmem:[%s2313_s1 + $0xa0] sm:$0xff] %v990_v48  ;;  %1035 = vst [vmem:[%s2313_s1 + $0x2a8] sm:$0xff] %v1034_v6  ;;  %v1038_v8 = vld [vmem:[%s2312_s0 + $0x28] sm:$0xff] }
  0x42   :  { %993 = vst [vmem:[%s2313_s1 + $0x3a0] sm:$0xff] %v992_v49  ;;  %v994_v50 = vld [vmem:[%s2312_s0 + $0xe0] sm:$0xff]  ;;  %v1040_v9 = vld [vmem:[%s2312_s0 + $0x328] sm:$0xff]  ;;  %1037 = vst [vmem:[%s2313_s1 + $0x5a8] sm:$0xff] %v1036_v7 }
  0x43   :  { %v996_v51 = vld [vmem:[%s2312_s0 + $0x3e0] sm:$0xff]  ;;  %995 = vst [vmem:[%s2313_s1 + $0x160] sm:$0xff] %v994_v50  ;;  %1039 = vst [vmem:[%s2313_s1 + $0xa8] sm:$0xff] %v1038_v8  ;;  %v1042_v10 = vld [vmem:[%s2312_s0 + $0xe8] sm:$0xff] }
  0x44   :  { %v998_v52 = vld [vmem:[%s2312_s0 + $0x1a0] sm:$0xff]  ;;  %997 = vst [vmem:[%s2313_s1 + $0x460] sm:$0xff] %v996_v51  ;;  %1041 = vst [vmem:[%s2313_s1 + $0x3a8] sm:$0xff] %v1040_v9  ;;  %v1044_v11 = vld [vmem:[%s2312_s0 + $0x3e8] sm:$0xff] }
  0x45   :  { %999 = vst [vmem:[%s2313_s1 + $0x220] sm:$0xff] %v998_v52  ;;  %v1000_v53 = vld [vmem:[%s2312_s0 + $0x4a0] sm:$0xff]  ;;  %v1046_v12 = vld [vmem:[%s2312_s0 + $0x1a8] sm:$0xff]  ;;  %1043 = vst [vmem:[%s2313_s1 + $0x168] sm:$0xff] %v1042_v10 }
  0x46   :  { %v1002_v54 = vld [vmem:[%s2312_s0 + $0x260] sm:$0xff]  ;;  %1001 = vst [vmem:[%s2313_s1 + $0x520] sm:$0xff] %v1000_v53  ;;  %1045 = vst [vmem:[%s2313_s1 + $0x468] sm:$0xff] %v1044_v11  ;;  %v1048_v13 = vld [vmem:[%s2312_s0 + $0x4a8] sm:$0xff] }
  0x47   :  { %v1004_v55 = vld [vmem:[%s2312_s0 + $0x560] sm:$0xff]  ;;  %1003 = vst [vmem:[%s2313_s1 + $0x2e0] sm:$0xff] %v1002_v54  ;;  %1047 = vst [vmem:[%s2313_s1 + $0x228] sm:$0xff] %v1046_v12  ;;  %v1050_v14 = vld [vmem:[%s2312_s0 + $0x268] sm:$0xff] }
  0x48   :  { %1005 = vst [vmem:[%s2313_s1 + $0x5e0] sm:$0xff] %v1004_v55  ;;  %v1052_v15 = vld [vmem:[%s2312_s0 + $0x568] sm:$0xff]  ;;  %1049 = vst [vmem:[%s2313_s1 + $0x528] sm:$0xff] %v1048_v13  ;;  %v1054_v16 = vld [vmem:[%s2312_s0 + $0xb0] sm:$0xff] }
  0x49   :  { %1051 = vst [vmem:[%s2313_s1 + $0x2e8] sm:$0xff] %v1050_v14  ;;  %1053 = vst [vmem:[%s2313_s1 + $0x5e8] sm:$0xff] %v1052_v15  ;;  %v1056_v17 = vld [vmem:[%s2312_s0 + $0x3b0] sm:$0xff]  ;;  %v1102_v40 = vld [vmem:[%s2312_s0 + $0xb8] sm:$0xff] }
  0x4a   :  { %v1058_v18 = vld [vmem:[%s2312_s0 + $0x170] sm:$0xff]  ;;  %1055 = vst [vmem:[%s2313_s1 + $0x30] sm:$0xff] %v1054_v16  ;;  %1057 = vst [vmem:[%s2313_s1 + $0x330] sm:$0xff] %v1056_v17  ;;  %v1104_v41 = vld [vmem:[%s2312_s0 + $0x3b8] sm:$0xff] }
  0x4b   :  { %1059 = vst [vmem:[%s2313_s1 + $0xf0] sm:$0xff] %v1058_v18  ;;  %v1060_v19 = vld [vmem:[%s2312_s0 + $0x470] sm:$0xff]  ;;  %v1106_v42 = vld [vmem:[%s2312_s0 + $0x178] sm:$0xff]  ;;  %1103 = vst [vmem:[%s2313_s1 + $0x38] sm:$0xff] %v1102_v40 }
  0x4c   :  { %v1062_v20 = vld [vmem:[%s2312_s0 + $0x230] sm:$0xff]  ;;  %1061 = vst [vmem:[%s2313_s1 + $0x3f0] sm:$0xff] %v1060_v19  ;;  %1105 = vst [vmem:[%s2313_s1 + $0x338] sm:$0xff] %v1104_v41  ;;  %v1108_v43 = vld [vmem:[%s2312_s0 + $0x478] sm:$0xff] }
  0x4d   :  { %v1064_v21 = vld [vmem:[%s2312_s0 + $0x530] sm:$0xff]  ;;  %1063 = vst [vmem:[%s2313_s1 + $0x1b0] sm:$0xff] %v1062_v20  ;;  %1107 = vst [vmem:[%s2313_s1 + $0xf8] sm:$0xff] %v1106_v42  ;;  %v1110_v44 = vld [vmem:[%s2312_s0 + $0x238] sm:$0xff] }
  0x4e   :  { %1065 = vst [vmem:[%s2313_s1 + $0x4b0] sm:$0xff] %v1064_v21  ;;  %v1066_v22 = vld [vmem:[%s2312_s0 + $0x2f0] sm:$0xff]  ;;  %v1112_v45 = vld [vmem:[%s2312_s0 + $0x538] sm:$0xff]  ;;  %1109 = vst [vmem:[%s2313_s1 + $0x3f8] sm:$0xff] %v1108_v43 }
  0x4f   :  { %v1068_v23 = vld [vmem:[%s2312_s0 + $0x5f0] sm:$0xff]  ;;  %1067 = vst [vmem:[%s2313_s1 + $0x270] sm:$0xff] %v1066_v22  ;;  %1111 = vst [vmem:[%s2313_s1 + $0x1b8] sm:$0xff] %v1110_v44  ;;  %v1114_v46 = vld [vmem:[%s2312_s0 + $0x2f8] sm:$0xff] }
  0x50   :  { %v1070_v24 = vld [vmem:[%s2312_s0 + $0x70] sm:$0xff]  ;;  %1069 = vst [vmem:[%s2313_s1 + $0x570] sm:$0xff] %v1068_v23  ;;  %1113 = vst [vmem:[%s2313_s1 + $0x4b8] sm:$0xff] %v1112_v45  ;;  %v1116_v47 = vld [vmem:[%s2312_s0 + $0x5f8] sm:$0xff] }
  0x51   :  { %1071 = vst [vmem:[%s2313_s1 + $0x70] sm:$0xff] %v1070_v24  ;;  %v1072_v25 = vld [vmem:[%s2312_s0 + $0x370] sm:$0xff]  ;;  %v1118_v48 = vld [vmem:[%s2312_s0 + $0x78] sm:$0xff]  ;;  %1115 = vst [vmem:[%s2313_s1 + $0x278] sm:$0xff] %v1114_v46 }
  0x52   :  { %v1074_v26 = vld [vmem:[%s2312_s0 + $0x130] sm:$0xff]  ;;  %1073 = vst [vmem:[%s2313_s1 + $0x370] sm:$0xff] %v1072_v25  ;;  %1117 = vst [vmem:[%s2313_s1 + $0x578] sm:$0xff] %v1116_v47  ;;  %v1120_v49 = vld [vmem:[%s2312_s0 + $0x378] sm:$0xff] }
  0x53   :  { %v1076_v27 = vld [vmem:[%s2312_s0 + $0x430] sm:$0xff]  ;;  %1075 = vst [vmem:[%s2313_s1 + $0x130] sm:$0xff] %v1074_v26  ;;  %1119 = vst [vmem:[%s2313_s1 + $0x78] sm:$0xff] %v1118_v48  ;;  %v1122_v50 = vld [vmem:[%s2312_s0 + $0x138] sm:$0xff] }
  0x54   :  { %1077 = vst [vmem:[%s2313_s1 + $0x430] sm:$0xff] %v1076_v27  ;;  %v1078_v28 = vld [vmem:[%s2312_s0 + $0x1f0] sm:$0xff]  ;;  %v1124_v51 = vld [vmem:[%s2312_s0 + $0x438] sm:$0xff]  ;;  %1121 = vst [vmem:[%s2313_s1 + $0x378] sm:$0xff] %v1120_v49 }
  0x55   :  { %v1080_v29 = vld [vmem:[%s2312_s0 + $0x4f0] sm:$0xff]  ;;  %1079 = vst [vmem:[%s2313_s1 + $0x1f0] sm:$0xff] %v1078_v28  ;;  %1123 = vst [vmem:[%s2313_s1 + $0x138] sm:$0xff] %v1122_v50  ;;  %v1126_v52 = vld [vmem:[%s2312_s0 + $0x1f8] sm:$0xff] }
  0x56   :  { %v1082_v30 = vld [vmem:[%s2312_s0 + $0x2b0] sm:$0xff]  ;;  %1081 = vst [vmem:[%s2313_s1 + $0x4f0] sm:$0xff] %v1080_v29  ;;  %1125 = vst [vmem:[%s2313_s1 + $0x438] sm:$0xff] %v1124_v51  ;;  %v1128_v53 = vld [vmem:[%s2312_s0 + $0x4f8] sm:$0xff] }
  0x57   :  { %1083 = vst [vmem:[%s2313_s1 + $0x2b0] sm:$0xff] %v1082_v30  ;;  %v1084_v31 = vld [vmem:[%s2312_s0 + $0x5b0] sm:$0xff]  ;;  %v1130_v54 = vld [vmem:[%s2312_s0 + $0x2b8] sm:$0xff]  ;;  %1127 = vst [vmem:[%s2313_s1 + $0x1f8] sm:$0xff] %v1126_v52 }
  0x58   :  { %v1086_v32 = vld [vmem:[%s2312_s0 + $0x30] sm:$0xff]  ;;  %1085 = vst [vmem:[%s2313_s1 + $0x5b0] sm:$0xff] %v1084_v31  ;;  %1129 = vst [vmem:[%s2313_s1 + $0x4f8] sm:$0xff] %v1128_v53  ;;  %v1132_v55 = vld [vmem:[%s2312_s0 + $0x5b8] sm:$0xff] }
  0x59   :  { %v1088_v33 = vld [vmem:[%s2312_s0 + $0x330] sm:$0xff]  ;;  %1087 = vst [vmem:[%s2313_s1 + $0xb0] sm:$0xff] %v1086_v32  ;;  %1131 = vst [vmem:[%s2313_s1 + $0x2b8] sm:$0xff] %v1130_v54  ;;  %v1134_v56 = vld [vmem:[%s2312_s0 + $0x38] sm:$0xff] }
  0x5a   :  { %1089 = vst [vmem:[%s2313_s1 + $0x3b0] sm:$0xff] %v1088_v33  ;;  %v1090_v34 = vld [vmem:[%s2312_s0 + $0xf0] sm:$0xff]  ;;  %v1136_v57 = vld [vmem:[%s2312_s0 + $0x338] sm:$0xff]  ;;  %1133 = vst [vmem:[%s2313_s1 + $0x5b8] sm:$0xff] %v1132_v55 }
  0x5b   :  { %v1092_v35 = vld [vmem:[%s2312_s0 + $0x3f0] sm:$0xff]  ;;  %1091 = vst [vmem:[%s2313_s1 + $0x170] sm:$0xff] %v1090_v34  ;;  %1135 = vst [vmem:[%s2313_s1 + $0xb8] sm:$0xff] %v1134_v56  ;;  %v1138_v58 = vld [vmem:[%s2312_s0 + $0xf8] sm:$0xff] }
  0x5c   :  { %v1094_v36 = vld [vmem:[%s2312_s0 + $0x1b0] sm:$0xff]  ;;  %1093 = vst [vmem:[%s2313_s1 + $0x470] sm:$0xff] %v1092_v35  ;;  %1137 = vst [vmem:[%s2313_s1 + $0x3b8] sm:$0xff] %v1136_v57  ;;  %v1140_v59 = vld [vmem:[%s2312_s0 + $0x3f8] sm:$0xff] }
  0x5d   :  { %1095 = vst [vmem:[%s2313_s1 + $0x230] sm:$0xff] %v1094_v36  ;;  %v1096_v37 = vld [vmem:[%s2312_s0 + $0x4b0] sm:$0xff]  ;;  %v1142_v60 = vld [vmem:[%s2312_s0 + $0x1b8] sm:$0xff]  ;;  %1139 = vst [vmem:[%s2313_s1 + $0x178] sm:$0xff] %v1138_v58 }
  0x5e   :  { %v1098_v38 = vld [vmem:[%s2312_s0 + $0x270] sm:$0xff]  ;;  %1097 = vst [vmem:[%s2313_s1 + $0x530] sm:$0xff] %v1096_v37  ;;  %1141 = vst [vmem:[%s2313_s1 + $0x478] sm:$0xff] %v1140_v59  ;;  %v1144_v61 = vld [vmem:[%s2312_s0 + $0x4b8] sm:$0xff] }
  0x5f   :  { %v1100_v39 = vld [vmem:[%s2312_s0 + $0x570] sm:$0xff]  ;;  %1099 = vst [vmem:[%s2313_s1 + $0x2f0] sm:$0xff] %v1098_v38  ;;  %1143 = vst [vmem:[%s2313_s1 + $0x238] sm:$0xff] %v1142_v60  ;;  %v1146_v62 = vld [vmem:[%s2312_s0 + $0x278] sm:$0xff] }
  0x60   :  { %1101 = vst [vmem:[%s2313_s1 + $0x5f0] sm:$0xff] %v1100_v39  ;;  %v1148_v63 = vld [vmem:[%s2312_s0 + $0x578] sm:$0xff]  ;;  %1145 = vst [vmem:[%s2313_s1 + $0x538] sm:$0xff] %v1144_v61 }
  0x61   :  { %1147 = vst [vmem:[%s2313_s1 + $0x2f8] sm:$0xff] %v1146_v62  ;;  %1149 = vst [vmem:[%s2313_s1 + $0x5f8] sm:$0xff] %v1148_v63 }

</bundles_post_ra>
